<compile_context>
chip_gen: v7x
topology: tpu7x:2x2x1
jax: 0.10.0
libtpu: 0.0.40
codegen_flags: <defaults>
</compile_context>

<pallas_src>
import math

import jax
import jax.numpy as jnp
from jax.experimental import pallas as pl
from jax.experimental.pallas import tpu as pltpu


GP = 128  # padded per-gate / padded hidden lane width (one full vreg of lanes)


# ----------------------------- Pallas kernel ------------------------------- #

def _encoder_lstm_kernel(xw_ref,     # (N, Bp, W)     window inputs, f32
                         w1i_ref,    # (W,  4*GP)     layer-1 input weights, bf16
                         w1h_ref,    # (GP, 4*GP)     layer-1 hidden weights, bf16
                         b1_ref,     # (1,  4*GP)     layer-1 bias (ih+hh), f32
                         w2i_ref,    # (GP, 4*GP)     layer-2 input weights, bf16
                         w2h_ref,    # (GP, 4*GP)     layer-2 hidden weights, bf16
                         b2_ref,     # (1,  4*GP)     layer-2 bias (ih+hh), f32
                         out_ref):   # (Bp, GP)       final hidden of rnn2 (padded)
    N, B, W = xw_ref.shape
    gp = out_ref.shape[1]
    g3 = 3 * gp
    f32 = jnp.float32
    bf16 = jnp.bfloat16

    # ---- Hoisted layer-1 input projection: one MXU call for all timesteps,
    #      bf16 operands, f32 accumulate, bias folded once.  Kept as SSA.
    xw = xw_ref[...].astype(bf16).reshape(N * B, W)
    px = (jnp.dot(xw, w1i_ref[...], preferred_element_type=f32)
          + b1_ref[...])                                     # (N*B, 4*GP) f32

    # ---- Hoisted layer-2 bias broadcast (JAX does not CSE broadcasts).
    b2b = jnp.broadcast_to(b2_ref[...], (B, 4 * gp))

    def cell(gates, c):
        # Gate blocks are 128-lane aligned in order (i | f | o | g):
        # one wide sigmoid over 3*GP, one tanh over GP, whole-vreg slices only.
        sig = jax.nn.sigmoid(gates[:, :g3])
        i = sig[:, 0:gp]
        f = sig[:, gp:2 * gp]
        o = sig[:, 2 * gp:g3]
        g = jnp.tanh(gates[:, g3:])
        c_new = f * c + i * g
        h_new = o * jnp.tanh(c_new)
        return h_new, c_new

    def cell_t0(gates):
        # Peeled t=0 cell: previous h, c are zero -> c_new = i * g (no f*c).
        i = jax.nn.sigmoid(gates[:, 0:gp])
        o = jax.nn.sigmoid(gates[:, 2 * gp:g3])
        g = jnp.tanh(gates[:, g3:])
        c_new = i * g
        h_new = o * jnp.tanh(c_new)
        return h_new, c_new

    # ---- t = 0 (peeled): no recurrent matmuls, no layer-2 hidden matmul.
    h1, c1 = cell_t0(px[0:B])
    g2 = jnp.dot(h1.astype(bf16), w2i_ref[...],
                 preferred_element_type=f32) + b2b
    h2, c2 = cell_t0(g2)

    # ---- t = 1 .. N-1 : straight-line unrolled recurrence.
    for t in range(1, N):
        # Layer 1: only the hidden matmul is on the serial path.
        g1 = px[t * B:(t + 1) * B] + jnp.dot(
            h1.astype(bf16), w1h_ref[...], preferred_element_type=f32)
        h1, c1 = cell(g1, c1)
        # Layer 2: two back-to-back MXU pushes, no lane concat.
        g2 = (jnp.dot(h1.astype(bf16), w2i_ref[...], preferred_element_type=f32)
              + jnp.dot(h2.astype(bf16), w2h_ref[...], preferred_element_type=f32)
              + b2b)
        h2, c2 = cell(g2, c2)

    out_ref[...] = h2


def encoder_forward_pallas(x_windows, kparams):
    """x_windows: (N, B, W) time-major windows. Returns (B, embedding_dim)."""
    N, B, W = x_windows.shape
    gp = kparams["GP"]
    H2 = kparams["H2"]

    # Pad batch up to a full sublane tile (multiple of 8); rows are independent.
    Bp = ((B + 7) // 8) * 8
    if Bp != B:
        x_windows = jnp.pad(x_windows, ((0, 0), (0, Bp - B), (0, 0)))

    vmem_spec = pl.BlockSpec(memory_space=pltpu.MemorySpace.VMEM)
    out = pl.pallas_call(
        _encoder_lstm_kernel,
        out_shape=jax.ShapeDtypeStruct((Bp, gp), jnp.float32),
        in_specs=[vmem_spec] * 7,
        out_specs=vmem_spec,
    )(x_windows,
      kparams["w1i"], kparams["w1h"], kparams["b1"],
      kparams["w2i"], kparams["w2h"], kparams["b2"])
    return out[:B, :H2]
    # TODO(synk): if B grows beyond a few sublane tiles, add a leading grid
    # axis over batch tiles with dimension_semantics=("parallel",) for v7x's
    # 2 TensorCores; if N/H grow, gridify over N ("arbitrary") and stream
    # windows via BlockSpec instead of holding them fully resident in VMEM.


# ------------------------------ JAX glue ----------------------------------- #

def sliding_window(x, original_window, window_size, stride):
    """Mirrors Encoder._sliding_window. x: (B, T) -> (B, N, W)."""
    count = math.ceil((original_window - window_size) / stride)
    starts = [i * stride for i in range(count)]
    if count * stride < original_window:
        starts.append(original_window - window_size)   # the trailing `[-window:]`
    wins = [x[:, s:s + window_size] for s in starts]
    return jnp.stack(wins, axis=1)                      # (B, N, W)


def init_params(key, n_features, embedding_dim):
    """Deterministic params matching nn.LSTM shapes (PyTorch gate order i,f,g,o),
    pre-transposed to (input_dim, 4H), biases folded b_ih + b_hh.  All f32."""
    H1 = 2 * embedding_dim
    H2 = embedding_dim
    ks = jax.random.split(key, 8)

    def u(k, shape, H):
        bound = 1.0 / math.sqrt(H)
        return jax.random.uniform(k, shape, jnp.float32, -bound, bound)

    w1_ih = u(ks[0], (4 * H1, n_features), H1)
    w1_hh = u(ks[1], (4 * H1, H1), H1)
    b1 = u(ks[2], (4 * H1,), H1) + u(ks[3], (4 * H1,), H1)
    w2_ih = u(ks[4], (4 * H2, H1), H2)
    w2_hh = u(ks[5], (4 * H2, H2), H2)
    b2 = u(ks[6], (4 * H2,), H2) + u(ks[7], (4 * H2,), H2)

    return {
        "w1i": w1_ih.T, "w1h": w1_hh.T, "b1": b1.reshape(1, -1),
        "w2i": w2_ih.T, "w2h": w2_hh.T, "b2": b2.reshape(1, -1),
        "H1": H1, "H2": H2,
    }


def _pad_reorder_gates(w, H, gp):
    """(..., 4H) in PyTorch gate order (i,f,g,o) -> (..., 4*gp) in order
    (i,f,o,g), each gate block zero-padded to gp lanes (128-aligned slots)."""
    i = w[..., 0:H]
    f = w[..., H:2 * H]
    g = w[..., 2 * H:3 * H]
    o = w[..., 3 * H:4 * H]
    pad = [(0, 0)] * (w.ndim - 1) + [(0, gp - H)]
    return jnp.concatenate([jnp.pad(b, pad) for b in (i, f, o, g)], axis=-1)


def _pad_rows(w, rp):
    """Zero-pad the leading (input/hidden) dim up to rp rows."""
    return jnp.pad(w, ((0, rp - w.shape[0]), (0, 0)))


def prepare_kernel_params(p, gp=GP):
    """Kernel-facing layout: gate order (i,f,o,g), each gate padded to 128
    lanes, hidden dims padded to 128 rows, weights cast to bf16 (MXU-native),
    biases kept f32."""
    H1, H2 = p["H1"], p["H2"]
    bf16 = jnp.bfloat16
    w1i = _pad_reorder_gates(p["w1i"], H1, gp).astype(bf16)              # (W,  4gp)
    w1h = _pad_rows(_pad_reorder_gates(p["w1h"], H1, gp), gp).astype(bf16)  # (gp, 4gp)
    b1 = _pad_reorder_gates(p["b1"], H1, gp)                             # (1,  4gp) f32
    w2i = _pad_rows(_pad_reorder_gates(p["w2i"], H2, gp), gp).astype(bf16)  # (gp, 4gp)
    w2h = _pad_rows(_pad_reorder_gates(p["w2h"], H2, gp), gp).astype(bf16)  # (gp, 4gp)
    b2 = _pad_reorder_gates(p["b2"], H2, gp)                             # (1,  4gp) f32
    return {"w1i": w1i, "w1h": w1h, "b1": b1,
            "w2i": w2i, "w2h": w2h, "b2": b2,
            "GP": gp, "H1": H1, "H2": H2}


def encoder_reference(x_windows_bnw, params):
    """Pure-JAX f32 reference of the two stacked LSTMs (PyTorch gate order)."""
    def run_lstm(seq, wi, wh, b, H):
        B = seq.shape[0]
        h = jnp.zeros((B, H), jnp.float32)
        c = jnp.zeros((B, H), jnp.float32)
        outs = []
        for t in range(seq.shape[1]):
            g = seq[:, t] @ wi + h @ wh + b
            i = jax.nn.sigmoid(g[:, :H])
            f = jax.nn.sigmoid(g[:, H:2 * H])
            gg = jnp.tanh(g[:, 2 * H:3 * H])
            o = jax.nn.sigmoid(g[:, 3 * H:])
            c = f * c + i * gg
            h = o * jnp.tanh(c)
            outs.append(h)
        return jnp.stack(outs, 1), h

    H1, H2 = params["H1"], params["H2"]
    y1, _ = run_lstm(x_windows_bnw, params["w1i"], params["w1h"], params["b1"], H1)
    _, h2 = run_lstm(y1, params["w2i"], params["w2h"], params["b2"], H2)
    return h2


# --------------------------------- main ------------------------------------ #

if __name__ == "__main__":
    class Config:
        small_window = 8
        small_stride = 4

    config = Config()
    batch = 2
    seq_len = 16
    embedding_dim = 32
    n_features = config.small_window        # each window is one LSTM timestep

    key = jax.random.PRNGKey(0)
    k_x, k_p = jax.random.split(key)
    x = jax.random.normal(k_x, (batch, seq_len), jnp.float32)   # (B, T)
    params = init_params(k_p, n_features, embedding_dim)
    kparams = prepare_kernel_params(params)

    # Sliding windows (glue), then time-major for the kernel.
    xw_bnw = sliding_window(x, seq_len, config.small_window, config.small_stride)
    xw_nbw = jnp.transpose(xw_bnw, (1, 0, 2))                   # (N, B, W)

    out = encoder_forward_pallas(xw_nbw, kparams)
    out = jax.block_until_ready(out)

    ref = encoder_reference(xw_bnw, params)
    assert out.shape == (batch, embedding_dim)
    # bf16 MXU operands => compare against the f32 reference with loose tol.
    assert jnp.allclose(out, ref, atol=2e-2, rtol=2e-2)

    print("KERNEL_OK")
</pallas_src>

<mosaic_0001>
module attributes {stable_mosaic.version = 11 : i64} {
  func.func @_encoder_lstm_kernel(%arg0: memref<3x8x8xf32, #tpu.memory_space<vmem>>, %arg1: memref<8x512xbf16, #tpu.memory_space<vmem>>, %arg2: memref<128x512xbf16, #tpu.memory_space<vmem>>, %arg3: memref<1x512xf32, #tpu.memory_space<vmem>>, %arg4: memref<128x512xbf16, #tpu.memory_space<vmem>>, %arg5: memref<128x512xbf16, #tpu.memory_space<vmem>>, %arg6: memref<1x512xf32, #tpu.memory_space<vmem>>, %arg7: memref<8x128xf32, #tpu.memory_space<vmem>>) attributes {dimension_semantics = [], scalar_prefetch = 0 : i64, scratch_operands = 0 : i64, tpu.core_type = #tpu.core_type<tc>} {
    %c0 = arith.constant 0 : index
    %c0_0 = arith.constant 0 : index
    %c0_1 = arith.constant 0 : index
    %0 = vector.load %arg0[%c0, %c0_0, %c0_1] : memref<3x8x8xf32, #tpu.memory_space<vmem>>, vector<3x8x8xf32>
    %1 = arith.truncf %0 : vector<3x8x8xf32> to vector<3x8x8xbf16>
    %2 = vector.shape_cast %1 : vector<3x8x8xbf16> to vector<24x8xbf16>
    %c0_2 = arith.constant 0 : index
    %c0_3 = arith.constant 0 : index
    %3 = vector.load %arg1[%c0_2, %c0_3] : memref<8x512xbf16, #tpu.memory_space<vmem>>, vector<8x512xbf16>
    %cst = arith.constant dense<0.000000e+00> : vector<24x512xf32>
    %4 = tpu.matmul %2, %3, %cst {dimension_numbers = #tpu.dot_dimension_numbers<[1], [0], [0], [1], [0, 0, 1, 1], [], []>} : vector<24x8xbf16>, vector<8x512xbf16>, vector<24x512xf32> -> vector<24x512xf32>
    %c0_4 = arith.constant 0 : index
    %c0_5 = arith.constant 0 : index
    %5 = vector.load %arg3[%c0_4, %c0_5] : memref<1x512xf32, #tpu.memory_space<vmem>>, vector<1x512xf32>
    %6 = vector.broadcast %5 : vector<1x512xf32> to vector<24x512xf32>
    %7 = arith.addf %4, %6 : vector<24x512xf32>
    %c0_6 = arith.constant 0 : index
    %c0_7 = arith.constant 0 : index
    %8 = vector.load %arg6[%c0_6, %c0_7] : memref<1x512xf32, #tpu.memory_space<vmem>>, vector<1x512xf32>
    %9 = vector.shape_cast %8 : vector<1x512xf32> to vector<1x512xf32>
    %10 = vector.broadcast %9 : vector<1x512xf32> to vector<8x512xf32>
    %11 = vector.extract_strided_slice %7 {offsets = [0, 0], sizes = [8, 512], strides = [1, 1]} : vector<24x512xf32> to vector<8x512xf32>
    %12 = vector.extract_strided_slice %11 {offsets = [0, 0], sizes = [8, 128], strides = [1, 1]} : vector<8x512xf32> to vector<8x128xf32>
    %13 = arith.negf %12 : vector<8x128xf32>
    %14 = math.exp %13 : vector<8x128xf32>
    %cst_8 = arith.constant 1.000000e+00 : f32
    %15 = vector.broadcast %cst_8 : f32 to vector<8x128xf32>
    %16 = arith.addf %15, %14 : vector<8x128xf32>
    %17 = arith.divf %15, %16 : vector<8x128xf32>
    %18 = vector.extract_strided_slice %11 {offsets = [0, 256], sizes = [8, 128], strides = [1, 1]} : vector<8x512xf32> to vector<8x128xf32>
    %19 = arith.negf %18 : vector<8x128xf32>
    %20 = math.exp %19 : vector<8x128xf32>
    %cst_9 = arith.constant 1.000000e+00 : f32
    %21 = vector.broadcast %cst_9 : f32 to vector<8x128xf32>
    %22 = arith.addf %21, %20 : vector<8x128xf32>
    %23 = arith.divf %21, %22 : vector<8x128xf32>
    %24 = vector.extract_strided_slice %11 {offsets = [0, 384], sizes = [8, 128], strides = [1, 1]} : vector<8x512xf32> to vector<8x128xf32>
    %25 = math.tanh %24 : vector<8x128xf32>
    %26 = arith.mulf %17, %25 : vector<8x128xf32>
    %27 = math.tanh %26 : vector<8x128xf32>
    %28 = arith.mulf %23, %27 : vector<8x128xf32>
    %29 = arith.truncf %28 : vector<8x128xf32> to vector<8x128xbf16>
    %c0_10 = arith.constant 0 : index
    %c0_11 = arith.constant 0 : index
    %30 = vector.load %arg4[%c0_10, %c0_11] : memref<128x512xbf16, #tpu.memory_space<vmem>>, vector<128x512xbf16>
    %cst_12 = arith.constant dense<0.000000e+00> : vector<8x512xf32>
    %31 = tpu.matmul %29, %30, %cst_12 {dimension_numbers = #tpu.dot_dimension_numbers<[1], [0], [0], [1], [0, 0, 1, 1], [], []>} : vector<8x128xbf16>, vector<128x512xbf16>, vector<8x512xf32> -> vector<8x512xf32>
    %32 = arith.addf %31, %10 : vector<8x512xf32>
    %33 = vector.extract_strided_slice %32 {offsets = [0, 0], sizes = [8, 128], strides = [1, 1]} : vector<8x512xf32> to vector<8x128xf32>
    %34 = arith.negf %33 : vector<8x128xf32>
    %35 = math.exp %34 : vector<8x128xf32>
    %cst_13 = arith.constant 1.000000e+00 : f32
    %36 = vector.broadcast %cst_13 : f32 to vector<8x128xf32>
    %37 = arith.addf %36, %35 : vector<8x128xf32>
    %38 = arith.divf %36, %37 : vector<8x128xf32>
    %39 = vector.extract_strided_slice %32 {offsets = [0, 256], sizes = [8, 128], strides = [1, 1]} : vector<8x512xf32> to vector<8x128xf32>
    %40 = arith.negf %39 : vector<8x128xf32>
    %41 = math.exp %40 : vector<8x128xf32>
    %cst_14 = arith.constant 1.000000e+00 : f32
    %42 = vector.broadcast %cst_14 : f32 to vector<8x128xf32>
    %43 = arith.addf %42, %41 : vector<8x128xf32>
    %44 = arith.divf %42, %43 : vector<8x128xf32>
    %45 = vector.extract_strided_slice %32 {offsets = [0, 384], sizes = [8, 128], strides = [1, 1]} : vector<8x512xf32> to vector<8x128xf32>
    %46 = math.tanh %45 : vector<8x128xf32>
    %47 = arith.mulf %38, %46 : vector<8x128xf32>
    %48 = math.tanh %47 : vector<8x128xf32>
    %49 = arith.mulf %44, %48 : vector<8x128xf32>
    %50 = vector.extract_strided_slice %7 {offsets = [8, 0], sizes = [8, 512], strides = [1, 1]} : vector<24x512xf32> to vector<8x512xf32>
    %51 = arith.truncf %28 : vector<8x128xf32> to vector<8x128xbf16>
    %c0_15 = arith.constant 0 : index
    %c0_16 = arith.constant 0 : index
    %52 = vector.load %arg2[%c0_15, %c0_16] : memref<128x512xbf16, #tpu.memory_space<vmem>>, vector<128x512xbf16>
    %cst_17 = arith.constant dense<0.000000e+00> : vector<8x512xf32>
    %53 = tpu.matmul %51, %52, %cst_17 {dimension_numbers = #tpu.dot_dimension_numbers<[1], [0], [0], [1], [0, 0, 1, 1], [], []>} : vector<8x128xbf16>, vector<128x512xbf16>, vector<8x512xf32> -> vector<8x512xf32>
    %54 = arith.addf %50, %53 : vector<8x512xf32>
    %55 = vector.extract_strided_slice %54 {offsets = [0, 0], sizes = [8, 384], strides = [1, 1]} : vector<8x512xf32> to vector<8x384xf32>
    %56 = arith.negf %55 : vector<8x384xf32>
    %57 = math.exp %56 : vector<8x384xf32>
    %cst_18 = arith.constant 1.000000e+00 : f32
    %58 = vector.broadcast %cst_18 : f32 to vector<8x384xf32>
    %59 = arith.addf %58, %57 : vector<8x384xf32>
    %60 = arith.divf %58, %59 : vector<8x384xf32>
    %61 = vector.extract_strided_slice %60 {offsets = [0, 0], sizes = [8, 128], strides = [1, 1]} : vector<8x384xf32> to vector<8x128xf32>
    %62 = vector.extract_strided_slice %60 {offsets = [0, 128], sizes = [8, 128], strides = [1, 1]} : vector<8x384xf32> to vector<8x128xf32>
    %63 = vector.extract_strided_slice %60 {offsets = [0, 256], sizes = [8, 128], strides = [1, 1]} : vector<8x384xf32> to vector<8x128xf32>
    %64 = vector.extract_strided_slice %54 {offsets = [0, 384], sizes = [8, 128], strides = [1, 1]} : vector<8x512xf32> to vector<8x128xf32>
    %65 = math.tanh %64 : vector<8x128xf32>
    %66 = arith.mulf %62, %26 : vector<8x128xf32>
    %67 = arith.mulf %61, %65 : vector<8x128xf32>
    %68 = arith.addf %66, %67 : vector<8x128xf32>
    %69 = math.tanh %68 : vector<8x128xf32>
    %70 = arith.mulf %63, %69 : vector<8x128xf32>
    %71 = arith.truncf %70 : vector<8x128xf32> to vector<8x128xbf16>
    %c0_19 = arith.constant 0 : index
    %c0_20 = arith.constant 0 : index
    %72 = vector.load %arg4[%c0_19, %c0_20] : memref<128x512xbf16, #tpu.memory_space<vmem>>, vector<128x512xbf16>
    %cst_21 = arith.constant dense<0.000000e+00> : vector<8x512xf32>
    %73 = tpu.matmul %71, %72, %cst_21 {dimension_numbers = #tpu.dot_dimension_numbers<[1], [0], [0], [1], [0, 0, 1, 1], [], []>} : vector<8x128xbf16>, vector<128x512xbf16>, vector<8x512xf32> -> vector<8x512xf32>
    %74 = arith.truncf %49 : vector<8x128xf32> to vector<8x128xbf16>
    %c0_22 = arith.constant 0 : index
    %c0_23 = arith.constant 0 : index
    %75 = vector.load %arg5[%c0_22, %c0_23] : memref<128x512xbf16, #tpu.memory_space<vmem>>, vector<128x512xbf16>
    %cst_24 = arith.constant dense<0.000000e+00> : vector<8x512xf32>
    %76 = tpu.matmul %74, %75, %cst_24 {dimension_numbers = #tpu.dot_dimension_numbers<[1], [0], [0], [1], [0, 0, 1, 1], [], []>} : vector<8x128xbf16>, vector<128x512xbf16>, vector<8x512xf32> -> vector<8x512xf32>
    %77 = arith.addf %73, %76 : vector<8x512xf32>
    %78 = arith.addf %77, %10 : vector<8x512xf32>
    %79 = vector.extract_strided_slice %78 {offsets = [0, 0], sizes = [8, 384], strides = [1, 1]} : vector<8x512xf32> to vector<8x384xf32>
    %80 = arith.negf %79 : vector<8x384xf32>
    %81 = math.exp %80 : vector<8x384xf32>
    %cst_25 = arith.constant 1.000000e+00 : f32
    %82 = vector.broadcast %cst_25 : f32 to vector<8x384xf32>
    %83 = arith.addf %82, %81 : vector<8x384xf32>
    %84 = arith.divf %82, %83 : vector<8x384xf32>
    %85 = vector.extract_strided_slice %84 {offsets = [0, 0], sizes = [8, 128], strides = [1, 1]} : vector<8x384xf32> to vector<8x128xf32>
    %86 = vector.extract_strided_slice %84 {offsets = [0, 128], sizes = [8, 128], strides = [1, 1]} : vector<8x384xf32> to vector<8x128xf32>
    %87 = vector.extract_strided_slice %84 {offsets = [0, 256], sizes = [8, 128], strides = [1, 1]} : vector<8x384xf32> to vector<8x128xf32>
    %88 = vector.extract_strided_slice %78 {offsets = [0, 384], sizes = [8, 128], strides = [1, 1]} : vector<8x512xf32> to vector<8x128xf32>
    %89 = math.tanh %88 : vector<8x128xf32>
    %90 = arith.mulf %86, %47 : vector<8x128xf32>
    %91 = arith.mulf %85, %89 : vector<8x128xf32>
    %92 = arith.addf %90, %91 : vector<8x128xf32>
    %93 = math.tanh %92 : vector<8x128xf32>
    %94 = arith.mulf %87, %93 : vector<8x128xf32>
    %95 = vector.extract_strided_slice %7 {offsets = [16, 0], sizes = [8, 512], strides = [1, 1]} : vector<24x512xf32> to vector<8x512xf32>
    %96 = arith.truncf %70 : vector<8x128xf32> to vector<8x128xbf16>
    %c0_26 = arith.constant 0 : index
    %c0_27 = arith.constant 0 : index
    %97 = vector.load %arg2[%c0_26, %c0_27] : memref<128x512xbf16, #tpu.memory_space<vmem>>, vector<128x512xbf16>
    %cst_28 = arith.constant dense<0.000000e+00> : vector<8x512xf32>
    %98 = tpu.matmul %96, %97, %cst_28 {dimension_numbers = #tpu.dot_dimension_numbers<[1], [0], [0], [1], [0, 0, 1, 1], [], []>} : vector<8x128xbf16>, vector<128x512xbf16>, vector<8x512xf32> -> vector<8x512xf32>
    %99 = arith.addf %95, %98 : vector<8x512xf32>
    %100 = vector.extract_strided_slice %99 {offsets = [0, 0], sizes = [8, 384], strides = [1, 1]} : vector<8x512xf32> to vector<8x384xf32>
    %101 = arith.negf %100 : vector<8x384xf32>
    %102 = math.exp %101 : vector<8x384xf32>
    %cst_29 = arith.constant 1.000000e+00 : f32
    %103 = vector.broadcast %cst_29 : f32 to vector<8x384xf32>
    %104 = arith.addf %103, %102 : vector<8x384xf32>
    %105 = arith.divf %103, %104 : vector<8x384xf32>
    %106 = vector.extract_strided_slice %105 {offsets = [0, 0], sizes = [8, 128], strides = [1, 1]} : vector<8x384xf32> to vector<8x128xf32>
    %107 = vector.extract_strided_slice %105 {offsets = [0, 128], sizes = [8, 128], strides = [1, 1]} : vector<8x384xf32> to vector<8x128xf32>
    %108 = vector.extract_strided_slice %105 {offsets = [0, 256], sizes = [8, 128], strides = [1, 1]} : vector<8x384xf32> to vector<8x128xf32>
    %109 = vector.extract_strided_slice %99 {offsets = [0, 384], sizes = [8, 128], strides = [1, 1]} : vector<8x512xf32> to vector<8x128xf32>
    %110 = math.tanh %109 : vector<8x128xf32>
    %111 = arith.mulf %107, %68 : vector<8x128xf32>
    %112 = arith.mulf %106, %110 : vector<8x128xf32>
    %113 = arith.addf %111, %112 : vector<8x128xf32>
    %114 = math.tanh %113 : vector<8x128xf32>
    %115 = arith.mulf %108, %114 : vector<8x128xf32>
    %116 = arith.truncf %115 : vector<8x128xf32> to vector<8x128xbf16>
    %c0_30 = arith.constant 0 : index
    %c0_31 = arith.constant 0 : index
    %117 = vector.load %arg4[%c0_30, %c0_31] : memref<128x512xbf16, #tpu.memory_space<vmem>>, vector<128x512xbf16>
    %cst_32 = arith.constant dense<0.000000e+00> : vector<8x512xf32>
    %118 = tpu.matmul %116, %117, %cst_32 {dimension_numbers = #tpu.dot_dimension_numbers<[1], [0], [0], [1], [0, 0, 1, 1], [], []>} : vector<8x128xbf16>, vector<128x512xbf16>, vector<8x512xf32> -> vector<8x512xf32>
    %119 = arith.truncf %94 : vector<8x128xf32> to vector<8x128xbf16>
    %c0_33 = arith.constant 0 : index
    %c0_34 = arith.constant 0 : index
    %120 = vector.load %arg5[%c0_33, %c0_34] : memref<128x512xbf16, #tpu.memory_space<vmem>>, vector<128x512xbf16>
    %cst_35 = arith.constant dense<0.000000e+00> : vector<8x512xf32>
    %121 = tpu.matmul %119, %120, %cst_35 {dimension_numbers = #tpu.dot_dimension_numbers<[1], [0], [0], [1], [0, 0, 1, 1], [], []>} : vector<8x128xbf16>, vector<128x512xbf16>, vector<8x512xf32> -> vector<8x512xf32>
    %122 = arith.addf %118, %121 : vector<8x512xf32>
    %123 = arith.addf %122, %10 : vector<8x512xf32>
    %124 = vector.extract_strided_slice %123 {offsets = [0, 0], sizes = [8, 384], strides = [1, 1]} : vector<8x512xf32> to vector<8x384xf32>
    %125 = arith.negf %124 : vector<8x384xf32>
    %126 = math.exp %125 : vector<8x384xf32>
    %cst_36 = arith.constant 1.000000e+00 : f32
    %127 = vector.broadcast %cst_36 : f32 to vector<8x384xf32>
    %128 = arith.addf %127, %126 : vector<8x384xf32>
    %129 = arith.divf %127, %128 : vector<8x384xf32>
    %130 = vector.extract_strided_slice %129 {offsets = [0, 0], sizes = [8, 128], strides = [1, 1]} : vector<8x384xf32> to vector<8x128xf32>
    %131 = vector.extract_strided_slice %129 {offsets = [0, 128], sizes = [8, 128], strides = [1, 1]} : vector<8x384xf32> to vector<8x128xf32>
    %132 = vector.extract_strided_slice %129 {offsets = [0, 256], sizes = [8, 128], strides = [1, 1]} : vector<8x384xf32> to vector<8x128xf32>
    %133 = vector.extract_strided_slice %123 {offsets = [0, 384], sizes = [8, 128], strides = [1, 1]} : vector<8x512xf32> to vector<8x128xf32>
    %134 = math.tanh %133 : vector<8x128xf32>
    %135 = arith.mulf %131, %92 : vector<8x128xf32>
    %136 = arith.mulf %130, %134 : vector<8x128xf32>
    %137 = arith.addf %135, %136 : vector<8x128xf32>
    %138 = math.tanh %137 : vector<8x128xf32>
    %139 = arith.mulf %132, %138 : vector<8x128xf32>
    %c0_37 = arith.constant 0 : index
    %c0_38 = arith.constant 0 : index
    %140 = vector.load %arg7[%c0_37, %c0_38] : memref<8x128xf32, #tpu.memory_space<vmem>>, vector<8x128xf32>
    tpu.vector_store %arg7[%c0_37, %c0_38], %139 {strides = array<i32>} : memref<8x128xf32, #tpu.memory_space<vmem>>, vector<8x128xf32>,
    return
  }
}

</mosaic_0001>

<bundles_post_ra>
// kernel: tpu_custom_call.1
= control target key start
LH: loop header
LB: loop body
LE: loop exit
PB: predicated region body
PF: predicated region fallthrough
CT: control target
= control target key end

     0   :  { %12 = vsyncpa [#allocation3], 0  ;;  %s2808_s0 = inlined_call_operand.hbm [shape: f32[3,8,8], index: 0, kind: input, shape index: {}]   ;;  %s2809_s1 = inlined_call_operand.hbm [shape: bf16[8,512], index: 1, kind: input, shape index: {}]   ;;  %s2810_s2 = inlined_call_operand.hbm [shape: bf16[128,512], index: 2, kind: input, shape index: {}]   ;;  %s2811_s3 = inlined_call_operand.vmem [shape: f32[1,512], index: 3, kind: input, shape index: {}]   ;;  %s2812_s4 = inlined_call_operand.hbm [shape: bf16[128,512], index: 4, kind: input, shape index: {}]   ;;  %s2813_s5 = inlined_call_operand.hbm [shape: bf16[128,512], index: 5, kind: input, shape index: {}]   ;;  %s2814_s6 = inlined_call_operand.vmem [shape: f32[1,512], index: 6, kind: input, shape index: {}]   ;;  %s2815_s7 = inlined_call_operand.hbm [shape: f32[8,128], index: 7, kind: output, shape index: {}]  }
   0x1   :  { %13 = vsyncpa [#allocation6], 0 }
   0x2   :  { %14 = vsyncpa [#allocation9], 0 }
   0x3   :  { %15 = vsyncpa [#allocation4], 0  ;;  %s2126_s24 = smov [#allocation5]   ;;  %s1986_s28 = scalar_lea.hbm %s2809_s1, 256 }
   0x4   :  { %s34_s25 = sshll.u32 %s2126_s24, 4  ;;  %p1987_p0 = scmp.ne.s32.totalorder %s2809_s1, %s1986_s28  ;;  %s35_s25 = int_to_ptr.vmem [resolvable:$true] %s34_s25 }
   0x5   :  { %p1990_p1 = scmp.lt.u32.totalorder %s1986_s28, %s2809_s1 }
   0x7   :  { %p1992_p2 = pnand %p1990_p1, %p1987_p0 }
   0x9   :  { %1995 = shalt.err (!%p1992_p2)
}
   0xa   :  { %s1996_s10 = scalar_lea.vmem %s35_s25, 256  ;;  %p2001_p4 = scmp.lt.s32.totalorder %s35_s25, %s35_s25 }
   0xb   :  { %p1997_p3 = scmp.ne.s32.totalorder %s35_s25, %s1996_s10  ;;  %p2002_p5 = scmp.lt.s32.totalorder %s1996_s10, %s1996_s10 }
   0xd   :  { %p2003_p6 = por %p2002_p5, %p2001_p4 }
   0xf   :  { %p2004_p7 = pnand %p2003_p6, %p1997_p3 }
  0x11   :  { %2007 = shalt.err (!%p2004_p7)
}
  0x12   :  { %37 = dma.hbm_to_vmem [thread:$0]  %s2809_s1, 256, %s35_s25, [#allocation6]  }
  0x13   :  { %s2127_s13 = smov [#allocation8]   ;;  %s2128_s15 = smov [#allocation2]  }
  0x14   :  { %s57_s14 = sshll.u32 %s2127_s13, 4  ;;  %s21_s16 = sshll.u32 %s2128_s15, 4  ;;  %s58_s14 = int_to_ptr.vmem [resolvable:$true] %s57_s14  ;;  %s22_s16 = int_to_ptr.vmem [resolvable:$true] %s21_s16 }
  0x15   :  { %s2008_s19 = scalar_lea.hbm %s2812_s4, 4096 }
  0x16   :  { %p2009_p8 = scmp.ne.s32.totalorder %s2812_s4, %s2008_s19  ;;  %p2012_p9 = scmp.lt.u32.totalorder %s2008_s19, %s2812_s4 }
  0x18   :  { %p2014_p10 = pnand %p2012_p9, %p2009_p8 }
  0x1a   :  { %2017 = shalt.err (!%p2014_p10)
}
  0x1b   :  { %s2018_s1 = scalar_lea.vmem %s58_s14, 4096  ;;  %p2023_p12 = scmp.lt.s32.totalorder %s58_s14, %s58_s14 }
  0x1c   :  { %p2019_p11 = scmp.ne.s32.totalorder %s58_s14, %s2018_s1  ;;  %p2024_p13 = scmp.lt.s32.totalorder %s2018_s1, %s2018_s1 }
  0x1e   :  { %p2025_p0 = por %p2024_p13, %p2023_p12 }
  0x20   :  { %p2026_p1 = pnand %p2025_p0, %p2019_p11 }
  0x22   :  { %2029 = shalt.err (!%p2026_p1)
}
  0x23   :  { %s2129_s24 = smov 256   ;;  %s2130_s25 = smov 16  }
  0x24   :  { %63 = dma.hbm_to_vmem [thread:$0]  %s2812_s4, 4096, %s58_s14, [#allocation9], %s2129_s24, %s2129_s24, %s2130_s25  }
  0x25   :  { %s2030_s30 = scalar_lea.hbm %s2808_s0, 384 }
  0x26   :  { %p2031_p2 = scmp.ne.s32.totalorder %s2808_s0, %s2030_s30  ;;  %p2034_p3 = scmp.lt.u32.totalorder %s2030_s30, %s2808_s0 }
  0x28   :  { %p2036_p4 = pnand %p2034_p3, %p2031_p2 }
  0x2a   :  { %2039 = shalt.err (!%p2036_p4)
}
  0x2b   :  { %s2040_s12 = scalar_lea.vmem %s22_s16, 384  ;;  %p2045_p6 = scmp.lt.s32.totalorder %s22_s16, %s22_s16 }
  0x2c   :  { %p2041_p5 = scmp.ne.s32.totalorder %s22_s16, %s2040_s12  ;;  %p2046_p7 = scmp.lt.s32.totalorder %s2040_s12, %s2040_s12 }
  0x2e   :  { %p2047_p8 = por %p2046_p7, %p2045_p6 }
  0x30   :  { %p2048_p9 = pnand %p2047_p8, %p2041_p5 }
  0x32   :  { %2051 = shalt.err (!%p2048_p9)
}
  0x33   :  { %s2131_s4 = smov 128   ;;  %s2132_s13 = smov 8  }
  0x34   :  { %27 = dma.hbm_to_vmem [thread:$0]  %s2808_s0, 384, %s22_s16, [#allocation3], %s2131_s4, %s2131_s4, %s2132_s13  }
  0x35   :  { %s2133_s17 = smov [#allocation7]   ;;  %s2134_s19 = smov [#allocation10]  }
  0x36   :  { %s43_s18 = sshll.u32 %s2133_s17, 4  ;;  %s69_s20 = sshll.u32 %s2134_s19, 4  ;;  %s44_s18 = int_to_ptr.vmem [resolvable:$true] %s43_s18  ;;  %s70_s20 = int_to_ptr.vmem [resolvable:$true] %s69_s20 }
  0x37   :  { %s2052_s23 = scalar_lea.hbm %s2810_s2, 4096 }
  0x38   :  { %p2053_p10 = scmp.ne.s32.totalorder %s2810_s2, %s2052_s23  ;;  %p2056_p11 = scmp.lt.u32.totalorder %s2052_s23, %s2810_s2 }
  0x3a   :  { %p2058_p12 = pnand %p2056_p11, %p2053_p10 }
  0x3c   :  { %2061 = shalt.err (!%p2058_p12)
}
  0x3d   :  { %s2062_s0 = scalar_lea.vmem %s44_s18, 4096  ;;  %p2067_p0 = scmp.lt.s32.totalorder %s44_s18, %s44_s18 }
  0x3e   :  { %p2063_p13 = scmp.ne.s32.totalorder %s44_s18, %s2062_s0  ;;  %p2068_p1 = scmp.lt.s32.totalorder %s2062_s0, %s2062_s0 }
  0x40   :  { %p2069_p2 = por %p2068_p1, %p2067_p0 }
  0x42   :  { %p2070_p3 = pnand %p2069_p2, %p2063_p13 }
  0x44   :  { %2073 = shalt.err (!%p2070_p3)
}
  0x45   :  { %49 = dma.hbm_to_vmem [thread:$0]  %s2810_s2, 4096, %s44_s18, [#allocation6], %s2129_s24, %s2129_s24, %s2130_s25  }
  0x46   :  { %s2074_s9 = scalar_lea.hbm %s2813_s5, 4096 }
  0x47   :  { %p2075_p4 = scmp.ne.s32.totalorder %s2813_s5, %s2074_s9  ;;  %p2078_p5 = scmp.lt.u32.totalorder %s2074_s9, %s2813_s5 }
  0x49   :  { %p2080_p6 = pnand %p2078_p5, %p2075_p4 }
  0x4b   :  { %2083 = shalt.err (!%p2080_p6)
}
  0x4c   :  { %s2084_s13 = scalar_lea.vmem %s70_s20, 4096  ;;  %p2089_p8 = scmp.lt.s32.totalorder %s70_s20, %s70_s20 }
  0x4d   :  { %p2085_p7 = scmp.ne.s32.totalorder %s70_s20, %s2084_s13  ;;  %p2090_p9 = scmp.lt.s32.totalorder %s2084_s13, %s2084_s13 }
  0x4f   :  { %p2091_p10 = por %p2090_p9, %p2089_p8 }
  0x51   :  { %p2092_p11 = pnand %p2091_p10, %p2085_p7 }
  0x53   :  { %2095 = shalt.err (!%p2092_p11)
}
  0x54   :  { %75 = dma.hbm_to_vmem [thread:$0]  %s2813_s5, 4096, %s70_s20, [#allocation9], %s2129_s24, %s2129_s24, %s2130_s25  }
  0x55   :  { %2118 = dma.done.wait [#allocation3], 384  }
  0x56   :  { %2119 = vsyncadd [#allocation3], 4294966912 }
  0x57   :  { %2120 = dma.done.wait [#allocation6], 4352  }
  0x58   :  { %2121 = vsyncadd [#allocation6], 4294962944 }
  0x59   :  { %2122 = dma.done.wait [#allocation9], 8192  }
  0x5a   :  { %2123 = vsyncadd [#allocation9], 4294959104  ;;  %v2819_v0 = vmov 0   ;;  %v100_v1 = vld [vmem:[#allocation5] sm:$0xff]  ;;  %vm149_vm0 = vcmask 1043456   ;;  %v94_v2 = vld [vmem:[#allocation2] sm:$0xff]  ;;  %v104_v48 = vlaneseq }
  0x5b   :  { %194 = vmatprep.mubr.bf16.mxu0 %v2819_v0  ;;  %244 = vmatprep.mubr.bf16.mxu1 %v2819_v0  ;;  %v95_v3 = vld [vmem:[#allocation2 + $0x8] sm:$0xff]  ;;  %v1604_v4 = vcombine.high %v100_v1, %v100_v1  ;;  %v1603_v5 = vcombine.low %v100_v1, %v100_v1  ;;  %v101_v6 = vld [vmem:[#allocation5 + $0x8] sm:$0xff]  ;;  %vm142_vm1 = vcmask 64512   ;;  %v96_v38 = vld [vmem:[#allocation2 + $0x10] sm:$0xff] }
  0x5c   :  { %v1606_v7 = vcombine.high %v101_v6, %v101_v6  ;;  %v1605_v8 = vcombine.low %v101_v6, %v101_v6  ;;  %v1725_v10 = vpack.c.bf16 %v95_v3, %v94_v2  ;;  %v2252_v12 = vld [vmem:[#allocation8 + $0x4] ss:$16 sps:$4 sm:$0xff]   ;;  %v2254_v13 = vld [vmem:[#allocation8 + $0xc] ss:$16 sps:$4 sm:$0xff]   ;;  %v2256_v14 = vld [vmem:[#allocation8] ss:$16 sps:$4 sm:$0xff]   ;;  %v1726_v40 = vpack.c.bf16 %v96_v38, %v96_v38 }
  0x5d   :  { %1607 = vmatprep.subr.msk.bf16.mxu0 %vm149_vm0, %v1604_v4  ;;  %v151_v9 = vsel %vm149_vm0, %v1603_v5, 0  ;;  %2891 = vst [vmem:[#allocation16_spill] sm:$0xff] %v2252_v12  ;;  %2892 = vst [vmem:[#allocation17_spill] sm:$0xff] %v2254_v13  ;;  %v2258_v15 = vld [vmem:[#allocation8 + $0x8] ss:$16 sps:$4 sm:$0xff]   ;;  %v2358_v49 = vshrl.u32 %v104_v48, 7 }
  0x5e   :  { %163 = vmatpush1.bf16.msra.mxu0 %v151_v9  ;;  %1610 = vmatprep.subr.msk.bf16.mxu1 %vm149_vm0, %v1606_v7  ;;  %v157_v11 = vsel %vm149_vm0, %v1605_v8, 0  ;;  %v2264_v16 = vld [vmem:[#allocation8 + $0x24] ss:$16 sps:$4 sm:$0xff]   ;;  %v2266_v17 = vld [vmem:[#allocation8 + $0x2c] ss:$16 sps:$4 sm:$0xff]  }
  0x5f   :  { %213 = vmatpush1.bf16.msra.mxu1 %v157_v11  ;;  %494 = vmatprep.subr.bf16.mxu0 %v2252_v12  ;;  %v2268_v18 = vld [vmem:[#allocation8 + $0x20] ss:$16 sps:$4 sm:$0xff]   ;;  %v2270_v19 = vld [vmem:[#allocation8 + $0x28] ss:$16 sps:$4 sm:$0xff]   ;;  %v2276_v20 = vld [vmem:[#allocation8 + $0x44] ss:$16 sps:$4 sm:$0xff]  }
  0x60   :  { %534 = vmatprep.subr.bf16.mxu1 %v2254_v13  ;;  %v2278_v21 = vld [vmem:[#allocation8 + $0x4c] ss:$16 sps:$4 sm:$0xff]   ;;  %v2280_v22 = vld [vmem:[#allocation8 + $0x40] ss:$16 sps:$4 sm:$0xff]   ;;  %v2282_v23 = vld [vmem:[#allocation8 + $0x48] ss:$16 sps:$4 sm:$0xff]  }
  0x61   :  { %1608 = vmatmul.mubr.msk.bf16.vlgmr.msra.gmra.mrb[0].mxu0 %vm142_vm1, %v1725_v10  ;;  %v2288_v24 = vld [vmem:[#allocation8 + $0x64] ss:$16 sps:$4 sm:$0xff]   ;;  %v2290_v25 = vld [vmem:[#allocation8 + $0x6c] ss:$16 sps:$4 sm:$0xff]   ;;  %v2292_v26 = vld [vmem:[#allocation8 + $0x60] ss:$16 sps:$4 sm:$0xff]  }
  0x62   :  { %1611 = vmatmul.mubr.msk.bf16.vlgmr.msra.gmra.mrb[0].mxu1 %vm142_vm1, %v1725_v10  ;;  %203 = vmatprep.mubr.bf16.mxu0 %v2819_v0  ;;  %v2294_v27 = vld [vmem:[#allocation8 + $0x68] ss:$16 sps:$4 sm:$0xff]   ;;  %v2300_v28 = vld [vmem:[#allocation8 + $0x84] ss:$16 sps:$4 sm:$0xff]   ;;  %v2302_v29 = vld [vmem:[#allocation8 + $0x8c] ss:$16 sps:$4 sm:$0xff]  }
  0x63   :  { %254 = vmatprep.mubr.bf16.mxu1 %v2819_v0  ;;  %495 = vmatpush1.bf16.msra.mxu0 %v2256_v14  ;;  %v2304_v30 = vld [vmem:[#allocation8 + $0x80] ss:$16 sps:$4 sm:$0xff]   ;;  %v2306_v31 = vld [vmem:[#allocation8 + $0x88] ss:$16 sps:$4 sm:$0xff]   ;;  %v2314_v33 = vld [vmem:[#allocation8 + $0xa4] ss:$16 sps:$4 sm:$0xff]  }
  0x64   :  { %535 = vmatpush1.bf16.msra.mxu1 %v2258_v15  ;;  %496 = vmatprep.subr.bf16.mxu0 %v2264_v16  ;;  %v2312_v32 = vld [vmem:[#allocation8 + $0xa0] ss:$16 sps:$4 sm:$0xff]   ;;  %v2316_v34 = vld [vmem:[#allocation8 + $0xa8] ss:$16 sps:$4 sm:$0xff]   ;;  %v2318_v35 = vld [vmem:[#allocation8 + $0xac] ss:$16 sps:$4 sm:$0xff]  }
  0x65   :  { %536 = vmatprep.subr.bf16.mxu1 %v2266_v17  ;;  %v2320_v36 = vld [vmem:[#allocation8 + $0xc4] ss:$16 sps:$4 sm:$0xff]   ;;  %v2323_v37 = vld [vmem:[#allocation8 + $0xcc] ss:$16 sps:$4 sm:$0xff]   ;;  %v2327_v39 = vld [vmem:[#allocation8 + $0xc0] ss:$16 sps:$4 sm:$0xff]  }
  0x66   :  { %v2331_v41 = vld [vmem:[#allocation8 + $0xc8] ss:$16 sps:$4 sm:$0xff]   ;;  %v2333_v42 = vld [vmem:[#allocation8 + $0xe4] ss:$16 sps:$4 sm:$0xff]   ;;  %v2337_v43 = vld [vmem:[#allocation8 + $0xec] ss:$16 sps:$4 sm:$0xff]  }
  0x67   :  { %497 = vmatpush1.bf16.msra.mxu0 %v2268_v18  ;;  %v2342_v44 = vld [vmem:[#allocation8 + $0xe0] ss:$16 sps:$4 sm:$0xff]   ;;  %v2347_v45 = vld [vmem:[#allocation8 + $0xe8] ss:$16 sps:$4 sm:$0xff]   ;;  %v2349_v46 = vld [vmem:[#allocation7 + $0x4] ss:$16 sps:$4 sm:$0xff]  }
  0x68   :  { %537 = vmatpush1.bf16.msra.mxu1 %v2270_v19  ;;  %498 = vmatprep.subr.bf16.mxu0 %v2276_v20  ;;  %v2352_v47 = vld [vmem:[#allocation7 + $0xc] ss:$16 sps:$4 sm:$0xff]   ;;  %v2818_v50 = vsub.s32 0, %v2358_v49  ;;  %v2364_v51 = vld [vmem:[%s2811_s3] sm:$0xf]  ;;  %v2817_v52 = vsub.s32 2, %v2358_v49 }
  0x69   :  { %538 = vmatprep.subr.bf16.mxu1 %v2278_v21  ;;  %1609 = vmatmul.mubr.msk.bf16.gmra.mrb[4].mxu0 %vm142_vm1, %v1726_v40  ;;  %v2816_v3 = vsub.s32 3, %v2358_v49 }
  0x6a   :  { %1612 = vmatmul.mubr.msk.bf16.gmra.mrb[4].mxu1 %vm142_vm1, %v1726_v40  ;;  %526 = vmatprep.mubr.bf16.mxu0 %v2819_v0  ;;  %v2370_v53 = vrot.slane %v2364_v51, %v2818_v50  ;;  %v2375_v55 = vrot.slane %v2364_v51, %v2817_v52  ;;  %v2449_v52 = vld [vmem:[#allocation7 + $0x80] ss:$16 sps:$4 sm:$0xff]   ;;  %v2451_v50 = vld [vmem:[#allocation7 + $0x88] ss:$16 sps:$4 sm:$0xff]  }
  0x6b   :  { %499 = vmatpush1.bf16.msra.mxu0 %v2280_v22  ;;  %566 = vmatprep.mubr.bf16.mxu1 %v2819_v0  ;;  %v2391_v5 = vrot.slane %v2364_v51, %v2816_v3  ;;  %v2445_v3 = vld [vmem:[#allocation7 + $0x8c] ss:$16 sps:$4 sm:$0xff]   ;;  %2908 = vst [vmem:[#allocation33_spill] sm:$0xff] %v2449_v52  ;;  %2909 = vst [vmem:[#allocation34_spill] sm:$0xff] %v2451_v50 }
  0x6c   :  { %539 = vmatpush1.bf16.msra.mxu1 %v2282_v23  ;;  %500 = vmatprep.subr.bf16.mxu0 %v2288_v24  ;;  %2893 = vst [vmem:[#allocation18_spill] sm:$0xff] %v2370_v53  ;;  %2894 = vst [vmem:[#allocation19_spill] sm:$0xff] %v2375_v55 }
  0x6d   :  { %540 = vmatprep.subr.bf16.mxu1 %v2290_v25  ;;  %2895 = vst [vmem:[#allocation20_spill] sm:$0xff] %v2391_v5  ;;  %2907 = vst [vmem:[#allocation32_spill] sm:$0xff] %v2445_v3 }
  0x6f   :  { %501 = vmatpush1.bf16.msra.mxu0 %v2292_v26 }
  0x70   :  { %541 = vmatpush1.bf16.msra.mxu1 %v2294_v27  ;;  %502 = vmatprep.subr.bf16.mxu0 %v2300_v28 }
  0x71   :  { %542 = vmatprep.subr.bf16.mxu1 %v2302_v29 }
  0x73   :  { %503 = vmatpush1.bf16.msra.mxu0 %v2304_v30 }
  0x74   :  { %543 = vmatpush1.bf16.msra.mxu1 %v2306_v31  ;;  %504 = vmatprep.subr.bf16.mxu0 %v2314_v33 }
  0x75   :  { %544 = vmatprep.subr.bf16.mxu1 %v2318_v35 }
  0x77   :  { %505 = vmatpush1.bf16.msra.mxu0 %v2312_v32 }
  0x78   :  { %545 = vmatpush1.bf16.msra.mxu1 %v2316_v34  ;;  %506 = vmatprep.subr.bf16.mxu0 %v2320_v36 }
  0x79   :  { %546 = vmatprep.subr.bf16.mxu1 %v2323_v37 }
  0x7b   :  { %507 = vmatpush1.bf16.msra.mxu0 %v2327_v39 }
  0x7c   :  { %547 = vmatpush1.bf16.msra.mxu1 %v2331_v41  ;;  %508 = vmatprep.subr.bf16.mxu0 %v2333_v42 }
  0x7d   :  { %548 = vmatprep.subr.bf16.mxu1 %v2337_v43 }
  0x7f   :  { %509 = vmatpush1.bf16.msra.mxu0 %v2342_v44 }
  0x80   :  { %549 = vmatpush1.bf16.msra.mxu1 %v2347_v45  ;;  %783 = vmatprep.subr.bf16.mxu0 %v2349_v46 }
  0x81   :  { %824 = vmatprep.subr.bf16.mxu1 %v2352_v47 }
 0x134   :  { %v196_v54 = vpop.f32.mrb[0].mxu0 }
 0x135   :  { %v197_v56 = vadd.f32 %v196_v54, %v2370_v53  ;;  %v198_v57 = vpop.f32.mrb[1].mxu0  ;;  %v246_v58 = vpop.f32.mrb[0].mxu1 }
 0x136   :  { %v2378_v59 = vpop.f32.mrb[2].mxu0  ;;  %v248_v60 = vpop.f32.mrb[1].mxu1  ;;  %v247_v1 = vadd.f32 %v246_v58, %v2375_v55  ;;  %v2397_v57 = vld [vmem:[#allocation7] ss:$16 sps:$4 sm:$0xff]   ;;  %v2399_v58 = vld [vmem:[#allocation7 + $0x8] ss:$16 sps:$4 sm:$0xff]  }
 0x137   :  { %v1613_v61 = vmul.f32 -1.442695, %v197_v56  ;;  %v2380_v62 = vpop.f32.mrb[3].mxu0  ;;  %v2382_v63 = vpop.f32.mrb[2].mxu1  ;;  %v249_v6 = vadd.f32 %v248_v60, %v2391_v5 }
 0x138   :  { %v2385_v2 = vpop.f32.mrb[3].mxu1  ;;  %v1614_v4 = vmul.f32 -1.442695, %v247_v1  ;;  %v2405_v1 = vld [vmem:[#allocation7 + $0x2c] ss:$16 sps:$4 sm:$0xff]  }
 0x139   :  { %1898 = vpow2.f32 %v1613_v61  ;;  %v2403_v61 = vld [vmem:[#allocation7 + $0x24] ss:$16 sps:$4 sm:$0xff]  }
 0x13a   :  { %1900 = vpow2.f32 %v1614_v4  ;;  %v2411_v4 = vld [vmem:[#allocation7 + $0x20] ss:$16 sps:$4 sm:$0xff]  }
 0x13b   :  { %1902 = vtanh.f32 %v249_v6  ;;  %2896 = vst [vmem:[#allocation21_spill] sm:$0xff] %v2411_v4  ;;  %v2413_v6 = vld [vmem:[#allocation7 + $0x28] ss:$16 sps:$4 sm:$0xff]  }
 0x13c   :  { %2897 = vst [vmem:[#allocation22_spill] sm:$0xff] %v2413_v6 }
 0x143   :  { %v1899_v7 = vpop.eup %1898 }
 0x144   :  { %v288_v8 = vadd.f32 1.0, %v1899_v7  ;;  %v1901_v9 = vpop.eup %1900  ;;  %v2417_v7 = vld [vmem:[#allocation7 + $0x44] ss:$16 sps:$4 sm:$0xff]  }
 0x145   :  { %v294_v10 = vadd.f32 1.0, %v1901_v9  ;;  %v1903_v11 = vpop.eup %1902  ;;  %2898 = vst [vmem:[#allocation23_spill] sm:$0xff] %v2417_v7  ;;  %v2425_v9 = vld [vmem:[#allocation7 + $0x40] ss:$16 sps:$4 sm:$0xff]  }
 0x146   :  { %1904 = vrcp.f32 %v288_v8  ;;  %v2419_v8 = vld [vmem:[#allocation7 + $0x4c] ss:$16 sps:$4 sm:$0xff]   ;;  %2900 = vst [vmem:[#allocation25_spill] sm:$0xff] %v2425_v9 }
 0x147   :  { %1906 = vrcp.f32 %v294_v10  ;;  %2899 = vst [vmem:[#allocation24_spill] sm:$0xff] %v2419_v8  ;;  %v2427_v10 = vld [vmem:[#allocation7 + $0x48] ss:$16 sps:$4 sm:$0xff]  }
 0x148   :  { %2901 = vst [vmem:[#allocation26_spill] sm:$0xff] %v2427_v10 }
 0x150   :  { %v1905_v38 = vpop.eup %1904 }
 0x151   :  { %v2394_v40 = vmul.f32 %v1905_v38, %v1903_v11  ;;  %v1907_v48 = vpop.eup %1906  ;;  %v2431_v11 = vld [vmem:[#allocation7 + $0x64] ss:$16 sps:$4 sm:$0xff]   ;;  %v2433_v38 = vld [vmem:[#allocation7 + $0x6c] ss:$16 sps:$4 sm:$0xff]  }
 0x152   :  { %2902 = vst [vmem:[#allocation27_spill] sm:$0xff] %v2431_v11  ;;  %2903 = vst [vmem:[#allocation28_spill] sm:$0xff] %v2433_v38 }
 0x153   :  { %1908 = vtanh.f32 %v2394_v40 }
 0x15d   :  { %v1909_v54 = vpop.eup %1908 }
 0x15e   :  { %v300_v56 = vmul.f32 %v1909_v54, %v1907_v48  ;;  %v2437_v48 = vld [vmem:[#allocation7 + $0x60] ss:$16 sps:$4 sm:$0xff]   ;;  %v2439_v54 = vld [vmem:[#allocation7 + $0x68] ss:$16 sps:$4 sm:$0xff]  }
 0x15f   :  { %2904 = vst [vmem:[#allocation29_spill] sm:$0xff] %v2437_v48  ;;  %2905 = vst [vmem:[#allocation30_spill] sm:$0xff] %v2439_v54 }
 0x160   :  { %v2401_v60 = vpack.c.bf16 %v300_v56, %v300_v56  ;;  %v2443_v56 = vld [vmem:[#allocation7 + $0x84] ss:$16 sps:$4 sm:$0xff]  }
 0x161   :  { %2906 = vst [vmem:[#allocation31_spill] sm:$0xff] %v2443_v56 }
 0x162   :  { %527 = vmatmul.mubr.bf16.vlgmr.msra.gmra.mrb[8].mxu0 %v2401_v60  ;;  %567 = vmatmul.mubr.bf16.vlgmr.msra.gmra.mrb[8].mxu1 %v2401_v60 }
 0x163   :  { %784 = vmatpush1.bf16.msra.mxu0 %v2397_v57  ;;  %825 = vmatpush1.bf16.msra.mxu1 %v2399_v58 }
 0x164   :  { %785 = vmatprep.subr.bf16.mxu0 %v2403_v61  ;;  %826 = vmatprep.subr.bf16.mxu1 %v2405_v1 }
 0x165   :  { %815 = vmatprep.mubr.bf16.mxu0 %v2819_v0  ;;  %856 = vmatprep.mubr.bf16.mxu1 %v2819_v0  ;;  %v2455_v0 = vld [vmem:[#allocation7 + $0xa4] ss:$16 sps:$4 sm:$0xff]  }
 0x166   :  { %2910 = vst [vmem:[#allocation35_spill] sm:$0xff] %v2455_v0 }
 0x167   :  { %786 = vmatpush1.bf16.msra.mxu0 %v2411_v4  ;;  %827 = vmatpush1.bf16.msra.mxu1 %v2413_v6  ;;  %v2958_v4 = vsub.s32 3, %v2358_v49 }
 0x168   :  { %787 = vmatprep.subr.bf16.mxu0 %v2417_v7  ;;  %828 = vmatprep.subr.bf16.mxu1 %v2419_v8 }
 0x16b   :  { %788 = vmatpush1.bf16.msra.mxu0 %v2425_v9  ;;  %829 = vmatpush1.bf16.msra.mxu1 %v2427_v10 }
 0x16c   :  { %789 = vmatprep.subr.bf16.mxu0 %v2431_v11  ;;  %830 = vmatprep.subr.bf16.mxu1 %v2433_v38  ;;  %v2457_v11 = vld [vmem:[#allocation7 + $0xac] ss:$16 sps:$4 sm:$0xff]   ;;  %v2461_v38 = vld [vmem:[#allocation7 + $0xa0] ss:$16 sps:$4 sm:$0xff]  }
 0x16d   :  { %2911 = vst [vmem:[#allocation36_spill] sm:$0xff] %v2457_v11  ;;  %2912 = vst [vmem:[#allocation37_spill] sm:$0xff] %v2461_v38 }
 0x16f   :  { %790 = vmatpush1.bf16.msra.mxu0 %v2437_v48  ;;  %831 = vmatpush1.bf16.msra.mxu1 %v2439_v54  ;;  %v2463_v48 = vld [vmem:[#allocation7 + $0xa8] ss:$16 sps:$4 sm:$0xff]   ;;  %v2467_v54 = vld [vmem:[#allocation7 + $0xc4] ss:$16 sps:$4 sm:$0xff]  }
 0x170   :  { %791 = vmatprep.subr.bf16.mxu0 %v2443_v56  ;;  %832 = vmatprep.subr.bf16.mxu1 %v2445_v3  ;;  %2913 = vst [vmem:[#allocation38_spill] sm:$0xff] %v2463_v48  ;;  %2914 = vst [vmem:[#allocation39_spill] sm:$0xff] %v2467_v54  ;;  %v2469_v56 = vld [vmem:[#allocation7 + $0xcc] ss:$16 sps:$4 sm:$0xff]   ;;  %v2473_v3 = vld [vmem:[#allocation7 + $0xc0] ss:$16 sps:$4 sm:$0xff]  }
 0x171   :  { %2915 = vst [vmem:[#allocation40_spill] sm:$0xff] %v2469_v56  ;;  %2916 = vst [vmem:[#allocation41_spill] sm:$0xff] %v2473_v3 }
 0x173   :  { %792 = vmatpush1.bf16.msra.mxu0 %v2449_v52  ;;  %833 = vmatpush1.bf16.msra.mxu1 %v2451_v50  ;;  %v2475_v52 = vld [vmem:[#allocation7 + $0xc8] ss:$16 sps:$4 sm:$0xff]   ;;  %v2479_v50 = vld [vmem:[#allocation7 + $0xe4] ss:$16 sps:$4 sm:$0xff]  }
 0x174   :  { %793 = vmatprep.subr.bf16.mxu0 %v2455_v0  ;;  %834 = vmatprep.subr.bf16.mxu1 %v2457_v11  ;;  %2917 = vst [vmem:[#allocation42_spill] sm:$0xff] %v2475_v52  ;;  %2918 = vst [vmem:[#allocation43_spill] sm:$0xff] %v2479_v50  ;;  %v2481_v0 = vld [vmem:[#allocation7 + $0xec] ss:$16 sps:$4 sm:$0xff]   ;;  %v2485_v11 = vld [vmem:[#allocation7 + $0xe0] ss:$16 sps:$4 sm:$0xff]  }
 0x175   :  { %2919 = vst [vmem:[#allocation44_spill] sm:$0xff] %v2481_v0  ;;  %2920 = vst [vmem:[#allocation45_spill] sm:$0xff] %v2485_v11 }
 0x177   :  { %794 = vmatpush1.bf16.msra.mxu0 %v2461_v38  ;;  %835 = vmatpush1.bf16.msra.mxu1 %v2463_v48  ;;  %v2487_v38 = vld [vmem:[#allocation7 + $0xe8] ss:$16 sps:$4 sm:$0xff]  }
 0x178   :  { %795 = vmatprep.subr.bf16.mxu0 %v2467_v54  ;;  %836 = vmatprep.subr.bf16.mxu1 %v2469_v56  ;;  %2921 = vst [vmem:[#allocation46_spill] sm:$0xff] %v2487_v38  ;;  %v2922_v56 = vmov 0   ;;  %v2501_v54 = vld [vmem:[#allocation10] ss:$16 sps:$4 sm:$0xff]  }
 0x179   :  { %2925 = vst [vmem:[#allocation49_spill] sm:$0xff] %v2501_v54 }
 0x17b   :  { %796 = vmatpush1.bf16.msra.mxu0 %v2473_v3  ;;  %837 = vmatpush1.bf16.msra.mxu1 %v2475_v52  ;;  %v2497_v52 = vld [vmem:[#allocation10 + $0x4] ss:$16 sps:$4 sm:$0xff]   ;;  %v2499_v3 = vld [vmem:[#allocation10 + $0xc] ss:$16 sps:$4 sm:$0xff]  }
 0x17c   :  { %797 = vmatprep.subr.bf16.mxu0 %v2479_v50  ;;  %838 = vmatprep.subr.bf16.mxu1 %v2481_v0  ;;  %2923 = vst [vmem:[#allocation47_spill] sm:$0xff] %v2497_v52  ;;  %2924 = vst [vmem:[#allocation48_spill] sm:$0xff] %v2499_v3  ;;  %v2503_v50 = vld [vmem:[#allocation10 + $0x8] ss:$16 sps:$4 sm:$0xff]  }
 0x17d   :  { %2926 = vst [vmem:[#allocation50_spill] sm:$0xff] %v2503_v50  ;;  %v2515_v0 = vld [vmem:[#allocation10 + $0x28] ss:$16 sps:$4 sm:$0xff]  }
 0x17e   :  { %2930 = vst [vmem:[#allocation54_spill] sm:$0xff] %v2515_v0 }
 0x17f   :  { %798 = vmatpush1.bf16.msra.mxu0 %v2485_v11  ;;  %839 = vmatpush1.bf16.msra.mxu1 %v2487_v38  ;;  %v2511_v38 = vld [vmem:[#allocation10 + $0x2c] ss:$16 sps:$4 sm:$0xff]   ;;  %v2513_v11 = vld [vmem:[#allocation10 + $0x20] ss:$16 sps:$4 sm:$0xff]  }
 0x180   :  { %1087 = vmatprep.subr.bf16.mxu0 %v2497_v52  ;;  %1128 = vmatprep.subr.bf16.mxu1 %v2499_v3  ;;  %2928 = vst [vmem:[#allocation52_spill] sm:$0xff] %v2511_v38  ;;  %2929 = vst [vmem:[#allocation53_spill] sm:$0xff] %v2513_v11  ;;  %v2521_v3 = vld [vmem:[#allocation10 + $0x44] ss:$16 sps:$4 sm:$0xff]   ;;  %v2527_v52 = vld [vmem:[#allocation10 + $0x48] ss:$16 sps:$4 sm:$0xff]  }
 0x181   :  { %2931 = vst [vmem:[#allocation55_spill] sm:$0xff] %v2521_v3  ;;  %2934 = vst [vmem:[#allocation58_spill] sm:$0xff] %v2527_v52 }
 0x182   :  { %816 = vmatmul.mubr.bf16.vlgmr.msra.gmra.mrb[12].mxu0 %v2401_v60  ;;  %857 = vmatmul.mubr.bf16.vlgmr.msra.gmra.mrb[12].mxu1 %v2401_v60  ;;  %v2509_v60 = vld [vmem:[#allocation10 + $0x24] ss:$16 sps:$4 sm:$0xff]  }
 0x183   :  { %1119 = vmatprep.mubr.bf16.mxu0 %v2922_v56  ;;  %1160 = vmatprep.mubr.bf16.mxu1 %v2922_v56  ;;  %2927 = vst [vmem:[#allocation51_spill] sm:$0xff] %v2509_v60 }
 0x184   :  { %1088 = vmatpush1.bf16.msra.mxu0 %v2501_v54  ;;  %1129 = vmatpush1.bf16.msra.mxu1 %v2503_v50  ;;  %v2523_v54 = vld [vmem:[#allocation10 + $0x4c] ss:$16 sps:$4 sm:$0xff]   ;;  %v2525_v50 = vld [vmem:[#allocation10 + $0x40] ss:$16 sps:$4 sm:$0xff]  }
 0x185   :  { %1089 = vmatprep.subr.bf16.mxu0 %v2509_v60  ;;  %1130 = vmatprep.subr.bf16.mxu1 %v2511_v38  ;;  %2932 = vst [vmem:[#allocation56_spill] sm:$0xff] %v2523_v54  ;;  %2933 = vst [vmem:[#allocation57_spill] sm:$0xff] %v2525_v50  ;;  %v2533_v38 = vld [vmem:[#allocation10 + $0x64] ss:$16 sps:$4 sm:$0xff]   ;;  %v2539_v60 = vld [vmem:[#allocation10 + $0x68] ss:$16 sps:$4 sm:$0xff]  }
 0x186   :  { %2935 = vst [vmem:[#allocation59_spill] sm:$0xff] %v2533_v38  ;;  %2938 = vst [vmem:[#allocation62_spill] sm:$0xff] %v2539_v60 }
 0x188   :  { %1090 = vmatpush1.bf16.msra.mxu0 %v2513_v11  ;;  %1131 = vmatpush1.bf16.msra.mxu1 %v2515_v0  ;;  %v2535_v11 = vld [vmem:[#allocation10 + $0x6c] ss:$16 sps:$4 sm:$0xff]   ;;  %v2537_v0 = vld [vmem:[#allocation10 + $0x60] ss:$16 sps:$4 sm:$0xff]  }
 0x189   :  { %1091 = vmatprep.subr.bf16.mxu0 %v2521_v3  ;;  %1132 = vmatprep.subr.bf16.mxu1 %v2523_v54  ;;  %2936 = vst [vmem:[#allocation60_spill] sm:$0xff] %v2535_v11  ;;  %2937 = vst [vmem:[#allocation61_spill] sm:$0xff] %v2537_v0  ;;  %v2545_v54 = vld [vmem:[#allocation10 + $0x84] ss:$16 sps:$4 sm:$0xff]   ;;  %v2551_v3 = vld [vmem:[#allocation10 + $0x88] ss:$16 sps:$4 sm:$0xff]  }
 0x18a   :  { %2939 = vst [vmem:[#allocation63_spill] sm:$0xff] %v2545_v54  ;;  %2942 = vst [vmem:[#allocation66_spill] sm:$0xff] %v2551_v3 }
 0x18c   :  { %1092 = vmatpush1.bf16.msra.mxu0 %v2525_v50  ;;  %1133 = vmatpush1.bf16.msra.mxu1 %v2527_v52  ;;  %v2547_v50 = vld [vmem:[#allocation10 + $0x8c] ss:$16 sps:$4 sm:$0xff]   ;;  %v2549_v52 = vld [vmem:[#allocation10 + $0x80] ss:$16 sps:$4 sm:$0xff]  }
 0x18d   :  { %1093 = vmatprep.subr.bf16.mxu0 %v2533_v38  ;;  %1134 = vmatprep.subr.bf16.mxu1 %v2535_v11  ;;  %2940 = vst [vmem:[#allocation64_spill] sm:$0xff] %v2547_v50  ;;  %2941 = vst [vmem:[#allocation65_spill] sm:$0xff] %v2549_v52  ;;  %v2557_v11 = vld [vmem:[#allocation10 + $0xa4] ss:$16 sps:$4 sm:$0xff]   ;;  %v2563_v38 = vld [vmem:[#allocation10 + $0xa8] ss:$16 sps:$4 sm:$0xff]  }
 0x18e   :  { %2943 = vst [vmem:[#allocation67_spill] sm:$0xff] %v2557_v11  ;;  %2946 = vst [vmem:[#allocation70_spill] sm:$0xff] %v2563_v38 }
 0x190   :  { %1094 = vmatpush1.bf16.msra.mxu0 %v2537_v0  ;;  %1135 = vmatpush1.bf16.msra.mxu1 %v2539_v60  ;;  %v2559_v0 = vld [vmem:[#allocation10 + $0xac] ss:$16 sps:$4 sm:$0xff]   ;;  %v2561_v60 = vld [vmem:[#allocation10 + $0xa0] ss:$16 sps:$4 sm:$0xff]  }
 0x191   :  { %1095 = vmatprep.subr.bf16.mxu0 %v2545_v54  ;;  %1136 = vmatprep.subr.bf16.mxu1 %v2547_v50  ;;  %2944 = vst [vmem:[#allocation68_spill] sm:$0xff] %v2559_v0  ;;  %2945 = vst [vmem:[#allocation69_spill] sm:$0xff] %v2561_v60  ;;  %v2569_v50 = vld [vmem:[#allocation10 + $0xc4] ss:$16 sps:$4 sm:$0xff]   ;;  %v2575_v54 = vld [vmem:[#allocation10 + $0xc8] ss:$16 sps:$4 sm:$0xff]  }
 0x192   :  { %2947 = vst [vmem:[#allocation71_spill] sm:$0xff] %v2569_v50  ;;  %2950 = vst [vmem:[#allocation74_spill] sm:$0xff] %v2575_v54 }
 0x194   :  { %1096 = vmatpush1.bf16.msra.mxu0 %v2549_v52  ;;  %1137 = vmatpush1.bf16.msra.mxu1 %v2551_v3  ;;  %v2571_v52 = vld [vmem:[#allocation10 + $0xcc] ss:$16 sps:$4 sm:$0xff]   ;;  %v2573_v3 = vld [vmem:[#allocation10 + $0xc0] ss:$16 sps:$4 sm:$0xff]  }
 0x195   :  { %1097 = vmatprep.subr.bf16.mxu0 %v2557_v11  ;;  %1138 = vmatprep.subr.bf16.mxu1 %v2559_v0  ;;  %2948 = vst [vmem:[#allocation72_spill] sm:$0xff] %v2571_v52  ;;  %2949 = vst [vmem:[#allocation73_spill] sm:$0xff] %v2573_v3  ;;  %v2581_v0 = vld [vmem:[#allocation10 + $0xe4] ss:$16 sps:$4 sm:$0xff]   ;;  %v2587_v11 = vld [vmem:[#allocation10 + $0xe8] ss:$16 sps:$4 sm:$0xff]  }
 0x196   :  { %2951 = vst [vmem:[#allocation75_spill] sm:$0xff] %v2581_v0  ;;  %2954 = vst [vmem:[#allocation78_spill] sm:$0xff] %v2587_v11 }
 0x198   :  { %1098 = vmatpush1.bf16.msra.mxu0 %v2561_v60  ;;  %1139 = vmatpush1.bf16.msra.mxu1 %v2563_v38  ;;  %v2583_v60 = vld [vmem:[#allocation10 + $0xec] ss:$16 sps:$4 sm:$0xff]   ;;  %v2585_v38 = vld [vmem:[#allocation10 + $0xe0] ss:$16 sps:$4 sm:$0xff]  }
 0x199   :  { %1099 = vmatprep.subr.bf16.mxu0 %v2569_v50  ;;  %1140 = vmatprep.subr.bf16.mxu1 %v2571_v52  ;;  %2952 = vst [vmem:[#allocation76_spill] sm:$0xff] %v2583_v60  ;;  %2953 = vst [vmem:[#allocation77_spill] sm:$0xff] %v2585_v38 }
 0x19c   :  { %1100 = vmatpush1.bf16.msra.mxu0 %v2573_v3  ;;  %1141 = vmatpush1.bf16.msra.mxu1 %v2575_v54  ;;  %v2598_v54 = vld [vmem:[%s2814_s6] sm:$0xf]  ;;  %v2955_v3 = vsub.s32 0, %v2358_v49  ;;  %s2136_s6 = smov [#allocation11]  }
 0x19d   :  { %1101 = vmatprep.subr.bf16.mxu0 %v2581_v0  ;;  %1142 = vmatprep.subr.bf16.mxu1 %v2583_v60  ;;  %s1590_s15 = sshll.u32 %s2136_s6, 4  ;;  %s1591_s15 = int_to_ptr.vmem [resolvable:$true] %s1590_s15 }
 0x19e   :  { %v2603_v52 = vrot.slane %v2598_v54, %v2955_v3  ;;  %s2096_s17 = scalar_lea.vmem %s1591_s15, 128  ;;  %p2101_p13 = scmp.lt.s32.totalorder %s1591_s15, %s1591_s15 }
 0x19f   :  { %p2097_p12 = scmp.ne.s32.totalorder %s1591_s15, %s2096_s17  ;;  %p2102_p0 = scmp.lt.s32.totalorder %s2096_s17, %s2096_s17 }
 0x1a0   :  { %1102 = vmatpush1.bf16.msra.mxu0 %v2585_v38  ;;  %1143 = vmatpush1.bf16.msra.mxu1 %v2587_v11  ;;  %2956 = vst [vmem:[#allocation79_spill] sm:$0xff] %v2603_v52  ;;  %v2957_v11 = vsub.s32 2, %v2358_v49 }
 0x1a1   :  { %1169 = vmatprep.subr.bf16.mxu0 %v2252_v12  ;;  %1210 = vmatprep.subr.bf16.mxu1 %v2254_v13  ;;  %p2103_p1 = por %p2102_p0, %p2101_p13 }
 0x1a2   :  { %v2609_v12 = vrot.slane %v2598_v54, %v2957_v11 }
 0x1a3   :  { %p2104_p2 = pnand %p2103_p1, %p2097_p12 }
 0x235   :  { %v528_v0 = vpop.f32.mrb[8].mxu0  ;;  %v568_v60 = vpop.f32.mrb[8].mxu1 }
 0x236   :  { %v529_v38 = vadd.f32 %v528_v0, %v2603_v52  ;;  %v530_v13 = vpop.f32.mrb[9].mxu0  ;;  %v570_v50 = vpop.f32.mrb[9].mxu1  ;;  %v569_v3 = vadd.f32 %v568_v60, %v2609_v12  ;;  %v2615_v0 = vrot.slane %v2598_v54, %v2958_v4  ;;  %v253_v60 = vadd.f32 %v2385_v2, %v2391_v5 }
 0x237   :  { %v531_v48 = vpop.f32.mrb[10].mxu0  ;;  %v572_v10 = vpop.f32.mrb[10].mxu1 }
 0x238   :  { %v1647_v9 = vmul.f32 -1.442695, %v529_v38  ;;  %v532_v8 = vpop.f32.mrb[11].mxu0  ;;  %v573_v7 = vpop.f32.mrb[11].mxu1  ;;  %v1648_v6 = vmul.f32 -1.442695, %v569_v3  ;;  %v571_v11 = vadd.f32 %v570_v50, %v2615_v0  ;;  %v200_v50 = vadd.f32 %v2378_v59, %v2370_v53 }
 0x239   :  { %2959 = vst [vmem:[#allocation80_spill] sm:$0xff] %v2615_v0  ;;  %v2883_v8 = vsub.s32 1, %v2358_v49 }
 0x23a   :  { %1910 = vpow2.f32 %v1647_v9 }
 0x23b   :  { %1912 = vpow2.f32 %v1648_v6  ;;  %v2622_v48 = vrot.slane %v2364_v51, %v2883_v8 }
 0x23c   :  { %1914 = vtanh.f32 %v571_v11 }
 0x23d   :  { %2960 = vst [vmem:[#allocation81_spill] sm:$0xff] %v2622_v48  ;;  %v202_v6 = vadd.f32 %v2380_v62, %v2622_v48 }
 0x244   :  { %v1911_v52 = vpop.eup %1910 }
 0x245   :  { %v578_v13 = vadd.f32 1.0, %v1911_v52  ;;  %v1913_v10 = vpop.eup %1912  ;;  %v251_v52 = vadd.f32 %v2382_v63, %v2375_v55 }
 0x246   :  { %v584_v7 = vadd.f32 1.0, %v1913_v10  ;;  %v1915_v9 = vpop.eup %1914 }
 0x247   :  { %1916 = vrcp.f32 %v578_v13 }
 0x248   :  { %1918 = vrcp.f32 %v584_v7 }
 0x251   :  { %v1917_v38 = vpop.eup %1916 }
 0x252   :  { %v2624_v4 = vmul.f32 %v1917_v38, %v1915_v9  ;;  %v1919_v62 = vpop.eup %1918 }
 0x254   :  { %2961 = vst [vmem:[#allocation82_spill] sm:$0xff] %v2624_v4  ;;  %1920 = vtanh.f32 %v2624_v4 }
 0x255   :  { %v817_v3 = vpop.f32.mrb[12].mxu0  ;;  %v858_v51 = vpop.f32.mrb[12].mxu1 }
 0x256   :  { %v865_v11 = vadd.f32 %v817_v3, %v200_v50  ;;  %v867_v13 = vadd.f32 %v858_v51, %v251_v52  ;;  %v819_v10 = vpop.f32.mrb[13].mxu0  ;;  %v860_v7 = vpop.f32.mrb[13].mxu1 }
 0x257   :  { %v866_v9 = vadd.f32 %v819_v10, %v202_v6  ;;  %v868_v38 = vadd.f32 %v860_v7, %v253_v60  ;;  %v821_v59 = vpop.f32.mrb[14].mxu0  ;;  %v862_v8 = vpop.f32.mrb[14].mxu1  ;;  %v2964_v10 = vld [vmem:[#allocation23_spill] sm:$0xff]  ;;  %v2965_v7 = vld [vmem:[#allocation24_spill] sm:$0xff] }
 0x258   :  { %v1681_v53 = vmul.f32 -1.442695, %v865_v11  ;;  %v822_v63 = vpop.f32.mrb[15].mxu0  ;;  %v863_v55 = vpop.f32.mrb[15].mxu1  ;;  %v1683_v5 = vmul.f32 -1.442695, %v867_v13 }
 0x259   :  { %v1682_v4 = vmul.f32 -1.442695, %v866_v9  ;;  %v2966_v9 = vld [vmem:[#allocation25_spill] sm:$0xff]  ;;  %v2972_v59 = vld [vmem:[#allocation31_spill] sm:$0xff]  ;;  %v2973_v63 = vld [vmem:[#allocation32_spill] sm:$0xff] }
 0x25a   :  { %1922 = vpow2.f32 %v1681_v53 }
 0x25b   :  { %1924 = vpow2.f32 %v1682_v4 }
 0x25c   :  { %1926 = vtanh.f32 %v868_v38  ;;  %v2971_v38 = vld [vmem:[#allocation30_spill] sm:$0xff] }
 0x25d   :  { %1928 = vpow2.f32 %v1683_v5 }
 0x25e   :  { %v1921_v48 = vpop.eup %1920 }
 0x25f   :  { %v590_v0 = vmul.f32 %v1921_v48, %v1919_v62  ;;  %v2974_v62 = vld [vmem:[#allocation33_spill] sm:$0xff] }
 0x261   :  { %v894_v2 = vpack.c.bf16 %v590_v0, %v590_v0 }
 0x263   :  { %1120 = vmatmul.mubr.bf16.vlgmr.msra.gmra.mrb[16].mxu0 %v894_v2  ;;  %1161 = vmatmul.mubr.bf16.vlgmr.msra.gmra.mrb[16].mxu1 %v894_v2  ;;  %v2975_v2 = vld [vmem:[#allocation34_spill] sm:$0xff] }
 0x264   :  { %v1923_v50 = vpop.eup %1922  ;;  %1170 = vmatpush1.bf16.msra.mxu0 %v2256_v14  ;;  %1211 = vmatpush1.bf16.msra.mxu1 %v2258_v15 }
 0x265   :  { %v878_v52 = vadd.f32 1.0, %v1923_v50  ;;  %1171 = vmatprep.subr.bf16.mxu0 %v2264_v16  ;;  %1212 = vmatprep.subr.bf16.mxu1 %v2266_v17  ;;  %v1925_v53 = vpop.eup %1924  ;;  %v2976_v50 = vld [vmem:[#allocation35_spill] sm:$0xff] }
 0x266   :  { %1201 = vmatprep.mubr.bf16.mxu0 %v2922_v56  ;;  %1242 = vmatprep.mubr.bf16.mxu1 %v2922_v56  ;;  %v879_v55 = vadd.f32 1.0, %v1925_v53  ;;  %v1927_v5 = vpop.eup %1926  ;;  %v2978_v53 = vld [vmem:[#allocation37_spill] sm:$0xff] }
 0x267   :  { %1930 = vrcp.f32 %v878_v52  ;;  %v1929_v0 = vpop.eup %1928  ;;  %v2977_v52 = vld [vmem:[#allocation36_spill] sm:$0xff] }
 0x268   :  { %1172 = vmatpush1.bf16.msra.mxu0 %v2268_v18  ;;  %1213 = vmatpush1.bf16.msra.mxu1 %v2270_v19  ;;  %1932 = vrcp.f32 %v879_v55  ;;  %v880_v6 = vadd.f32 1.0, %v1929_v0  ;;  %v2979_v55 = vld [vmem:[#allocation38_spill] sm:$0xff]  ;;  %v2981_v0 = vld [vmem:[#allocation40_spill] sm:$0xff] }
 0x269   :  { %1173 = vmatprep.subr.bf16.mxu0 %v2276_v20  ;;  %1214 = vmatprep.subr.bf16.mxu1 %v2278_v21 }
 0x26a   :  { %1934 = vrcp.f32 %v880_v6  ;;  %v2985_v6 = vld [vmem:[#allocation44_spill] sm:$0xff] }
 0x26c   :  { %1174 = vmatpush1.bf16.msra.mxu0 %v2280_v22  ;;  %1215 = vmatpush1.bf16.msra.mxu1 %v2282_v23 }
 0x26d   :  { %1175 = vmatprep.subr.bf16.mxu0 %v2288_v24  ;;  %1216 = vmatprep.subr.bf16.mxu1 %v2290_v25 }
 0x270   :  { %1176 = vmatpush1.bf16.msra.mxu0 %v2292_v26  ;;  %1217 = vmatpush1.bf16.msra.mxu1 %v2294_v27 }
 0x271   :  { %v1931_v8 = vpop.eup %1930  ;;  %1177 = vmatprep.subr.bf16.mxu0 %v2300_v28  ;;  %1218 = vmatprep.subr.bf16.mxu1 %v2302_v29 }
 0x272   :  { %v889_v48 = vmul.f32 %v1931_v8, %v1927_v5  ;;  %v1933_v4 = vpop.eup %1932  ;;  %v2980_v5 = vld [vmem:[#allocation39_spill] sm:$0xff]  ;;  %v2982_v8 = vld [vmem:[#allocation41_spill] sm:$0xff] }
 0x273   :  { %v888_v60 = vmul.f32 %v1933_v4, %v2394_v40  ;;  %v2984_v4 = vld [vmem:[#allocation43_spill] sm:$0xff] }
 0x274   :  { %1178 = vmatpush1.bf16.msra.mxu0 %v2304_v30  ;;  %1219 = vmatpush1.bf16.msra.mxu1 %v2306_v31  ;;  %v1935_v40 = vpop.eup %1934 }
 0x275   :  { %1179 = vmatprep.subr.bf16.mxu0 %v2314_v33  ;;  %1220 = vmatprep.subr.bf16.mxu1 %v2318_v35  ;;  %v2658_v3 = vadd.f32 %v889_v48, %v888_v60  ;;  %v2983_v48 = vld [vmem:[#allocation42_spill] sm:$0xff]  ;;  %v2986_v60 = vld [vmem:[#allocation45_spill] sm:$0xff] }
 0x277   :  { %1936 = vtanh.f32 %v2658_v3 }
 0x278   :  { %1180 = vmatpush1.bf16.msra.mxu0 %v2312_v32  ;;  %1221 = vmatpush1.bf16.msra.mxu1 %v2316_v34 }
 0x279   :  { %1181 = vmatprep.subr.bf16.mxu0 %v2320_v36  ;;  %1222 = vmatprep.subr.bf16.mxu1 %v2323_v37 }
 0x27c   :  { %1182 = vmatpush1.bf16.msra.mxu0 %v2327_v39  ;;  %1223 = vmatpush1.bf16.msra.mxu1 %v2331_v41 }
 0x27d   :  { %1183 = vmatprep.subr.bf16.mxu0 %v2333_v42  ;;  %1224 = vmatprep.subr.bf16.mxu1 %v2337_v43 }
 0x280   :  { %1184 = vmatpush1.bf16.msra.mxu0 %v2342_v44  ;;  %1225 = vmatpush1.bf16.msra.mxu1 %v2347_v45 }
 0x281   :  { %1279 = vmatprep.subr.bf16.mxu0 %v2349_v46  ;;  %1320 = vmatprep.subr.bf16.mxu1 %v2352_v47  ;;  %v1937_v51 = vpop.eup %1936  ;;  %v2962_v46 = vld [vmem:[#allocation21_spill] sm:$0xff]  ;;  %v2963_v47 = vld [vmem:[#allocation22_spill] sm:$0xff] }
 0x282   :  { %v892_v11 = vmul.f32 %v1937_v51, %v1935_v40  ;;  %v2987_v40 = vld [vmem:[#allocation46_spill] sm:$0xff]  ;;  %v2988_v51 = vld [vmem:[#allocation47_spill] sm:$0xff] }
 0x284   :  { %v893_v13 = vpack.c.bf16 %v892_v11, %v892_v11  ;;  %v2989_v11 = vld [vmem:[#allocation48_spill] sm:$0xff] }
 0x286   :  { %1202 = vmatmul.mubr.bf16.vlgmr.msra.gmra.mrb[20].mxu0 %v893_v13  ;;  %1243 = vmatmul.mubr.bf16.vlgmr.msra.gmra.mrb[20].mxu1 %v893_v13 }
 0x287   :  { %1280 = vmatpush1.bf16.msra.mxu0 %v2397_v57  ;;  %1321 = vmatpush1.bf16.msra.mxu1 %v2399_v58  ;;  %v2967_v57 = vld [vmem:[#allocation26_spill] sm:$0xff]  ;;  %v2968_v58 = vld [vmem:[#allocation27_spill] sm:$0xff] }
 0x288   :  { %1281 = vmatprep.subr.bf16.mxu0 %v2403_v61  ;;  %1322 = vmatprep.subr.bf16.mxu1 %v2405_v1  ;;  %v2969_v61 = vld [vmem:[#allocation28_spill] sm:$0xff]  ;;  %v2970_v1 = vld [vmem:[#allocation29_spill] sm:$0xff] }
 0x289   :  { %1311 = vmatprep.mubr.bf16.mxu0 %v2922_v56  ;;  %1352 = vmatprep.mubr.bf16.mxu1 %v2922_v56 }
 0x28b   :  { %1282 = vmatpush1.bf16.msra.mxu0 %v2962_v46  ;;  %1323 = vmatpush1.bf16.msra.mxu1 %v2963_v47  ;;  %v2990_v46 = vld [vmem:[#allocation49_spill] sm:$0xff]  ;;  %v2991_v47 = vld [vmem:[#allocation50_spill] sm:$0xff] }
 0x28c   :  { %1283 = vmatprep.subr.bf16.mxu0 %v2964_v10  ;;  %1324 = vmatprep.subr.bf16.mxu1 %v2965_v7  ;;  %v2992_v10 = vld [vmem:[#allocation51_spill] sm:$0xff]  ;;  %v2993_v7 = vld [vmem:[#allocation52_spill] sm:$0xff] }
 0x28f   :  { %1284 = vmatpush1.bf16.msra.mxu0 %v2966_v9  ;;  %1325 = vmatpush1.bf16.msra.mxu1 %v2967_v57  ;;  %v2994_v9 = vld [vmem:[#allocation53_spill] sm:$0xff]  ;;  %v2995_v57 = vld [vmem:[#allocation54_spill] sm:$0xff] }
 0x290   :  { %1285 = vmatprep.subr.bf16.mxu0 %v2968_v58  ;;  %1326 = vmatprep.subr.bf16.mxu1 %v2969_v61  ;;  %v2996_v58 = vld [vmem:[#allocation55_spill] sm:$0xff]  ;;  %v2997_v61 = vld [vmem:[#allocation56_spill] sm:$0xff] }
 0x293   :  { %1286 = vmatpush1.bf16.msra.mxu0 %v2970_v1  ;;  %1327 = vmatpush1.bf16.msra.mxu1 %v2971_v38  ;;  %v2999_v1 = vld [vmem:[#allocation58_spill] sm:$0xff]  ;;  %v3000_v38 = vld [vmem:[#allocation59_spill] sm:$0xff] }
 0x294   :  { %1287 = vmatprep.subr.bf16.mxu0 %v2972_v59  ;;  %1328 = vmatprep.subr.bf16.mxu1 %v2973_v63  ;;  %v3001_v59 = vld [vmem:[#allocation60_spill] sm:$0xff]  ;;  %v3002_v63 = vld [vmem:[#allocation61_spill] sm:$0xff] }
 0x297   :  { %1288 = vmatpush1.bf16.msra.mxu0 %v2974_v62  ;;  %1329 = vmatpush1.bf16.msra.mxu1 %v2975_v2  ;;  %v3003_v62 = vld [vmem:[#allocation62_spill] sm:$0xff]  ;;  %v3004_v2 = vld [vmem:[#allocation63_spill] sm:$0xff] }
 0x298   :  { %1289 = vmatprep.subr.bf16.mxu0 %v2976_v50  ;;  %1330 = vmatprep.subr.bf16.mxu1 %v2977_v52  ;;  %v3005_v50 = vld [vmem:[#allocation64_spill] sm:$0xff]  ;;  %v3006_v52 = vld [vmem:[#allocation65_spill] sm:$0xff] }
 0x29b   :  { %1290 = vmatpush1.bf16.msra.mxu0 %v2978_v53  ;;  %1331 = vmatpush1.bf16.msra.mxu1 %v2979_v55  ;;  %v3007_v53 = vld [vmem:[#allocation66_spill] sm:$0xff]  ;;  %v3008_v55 = vld [vmem:[#allocation67_spill] sm:$0xff] }
 0x29c   :  { %1291 = vmatprep.subr.bf16.mxu0 %v2980_v5  ;;  %1332 = vmatprep.subr.bf16.mxu1 %v2981_v0  ;;  %v3009_v5 = vld [vmem:[#allocation68_spill] sm:$0xff]  ;;  %v3010_v0 = vld [vmem:[#allocation69_spill] sm:$0xff] }
 0x29f   :  { %1292 = vmatpush1.bf16.msra.mxu0 %v2982_v8  ;;  %1333 = vmatpush1.bf16.msra.mxu1 %v2983_v48  ;;  %v3011_v8 = vld [vmem:[#allocation70_spill] sm:$0xff]  ;;  %v3012_v48 = vld [vmem:[#allocation71_spill] sm:$0xff] }
 0x2a0   :  { %1293 = vmatprep.subr.bf16.mxu0 %v2984_v4  ;;  %1334 = vmatprep.subr.bf16.mxu1 %v2985_v6  ;;  %v3013_v4 = vld [vmem:[#allocation72_spill] sm:$0xff]  ;;  %v3014_v6 = vld [vmem:[#allocation73_spill] sm:$0xff] }
 0x2a3   :  { %1294 = vmatpush1.bf16.msra.mxu0 %v2986_v60  ;;  %1335 = vmatpush1.bf16.msra.mxu1 %v2987_v40  ;;  %v3015_v60 = vld [vmem:[#allocation74_spill] sm:$0xff]  ;;  %v3016_v40 = vld [vmem:[#allocation75_spill] sm:$0xff] }
 0x2a4   :  { %1391 = vmatprep.subr.bf16.mxu0 %v2988_v51  ;;  %1432 = vmatprep.subr.bf16.mxu1 %v2989_v11  ;;  %v3017_v51 = vld [vmem:[#allocation76_spill] sm:$0xff]  ;;  %v3018_v11 = vld [vmem:[#allocation77_spill] sm:$0xff] }
 0x2a6   :  { %1312 = vmatmul.mubr.bf16.vlgmr.msra.gmra.mrb[4].mxu0 %v893_v13  ;;  %1353 = vmatmul.mubr.bf16.vlgmr.msra.gmra.mrb[4].mxu1 %v893_v13  ;;  %v2998_v13 = vld [vmem:[#allocation57_spill] sm:$0xff] }
 0x2a7   :  { %1392 = vmatpush1.bf16.msra.mxu0 %v2990_v46  ;;  %1433 = vmatpush1.bf16.msra.mxu1 %v2991_v47  ;;  %v3019_v46 = vld [vmem:[#allocation78_spill] sm:$0xff]  ;;  %v3020_v47 = vld [vmem:[#allocation16_spill] sm:$0xff] }
 0x2a8   :  { %1393 = vmatprep.subr.bf16.mxu0 %v2992_v10  ;;  %1434 = vmatprep.subr.bf16.mxu1 %v2993_v7  ;;  %v3021_v10 = vld [vmem:[#allocation17_spill] sm:$0xff] }
 0x2a9   :  { %1423 = vmatprep.mubr.bf16.mxu0 %v2922_v56  ;;  %1464 = vmatprep.mubr.bf16.mxu1 %v2922_v56 }
 0x2ab   :  { %1394 = vmatpush1.bf16.msra.mxu0 %v2994_v9  ;;  %1435 = vmatpush1.bf16.msra.mxu1 %v2995_v57 }
 0x2ac   :  { %1395 = vmatprep.subr.bf16.mxu0 %v2996_v58  ;;  %1436 = vmatprep.subr.bf16.mxu1 %v2997_v61 }
 0x2af   :  { %1396 = vmatpush1.bf16.msra.mxu0 %v2998_v13  ;;  %1437 = vmatpush1.bf16.msra.mxu1 %v2999_v1 }
 0x2b0   :  { %1397 = vmatprep.subr.bf16.mxu0 %v3000_v38  ;;  %1438 = vmatprep.subr.bf16.mxu1 %v3001_v59 }
 0x2b3   :  { %1398 = vmatpush1.bf16.msra.mxu0 %v3002_v63  ;;  %1439 = vmatpush1.bf16.msra.mxu1 %v3003_v62  ;;  %v3022_v62 = vsub.s32 1, %v2358_v49 }
 0x2b4   :  { %1399 = vmatprep.subr.bf16.mxu0 %v3004_v2  ;;  %1440 = vmatprep.subr.bf16.mxu1 %v3005_v50 }
 0x2b5   :  { %v2744_v2 = vrot.slane %v2598_v54, %v3022_v62  ;;  %v3024_v54 = vld [vmem:[#allocation80_spill] sm:$0xff] }
 0x2b7   :  { %1400 = vmatpush1.bf16.msra.mxu0 %v3006_v52  ;;  %1441 = vmatpush1.bf16.msra.mxu1 %v3007_v53 }
 0x2b8   :  { %1401 = vmatprep.subr.bf16.mxu0 %v3008_v55  ;;  %1442 = vmatprep.subr.bf16.mxu1 %v3009_v5 }
 0x2bb   :  { %1402 = vmatpush1.bf16.msra.mxu0 %v3010_v0  ;;  %1443 = vmatpush1.bf16.msra.mxu1 %v3011_v8 }
 0x2bc   :  { %1403 = vmatprep.subr.bf16.mxu0 %v3012_v48  ;;  %1444 = vmatprep.subr.bf16.mxu1 %v3013_v4  ;;  %v3023_v4 = vld [vmem:[#allocation79_spill] sm:$0xff] }
 0x2bf   :  { %1404 = vmatpush1.bf16.msra.mxu0 %v3014_v6  ;;  %1445 = vmatpush1.bf16.msra.mxu1 %v3015_v60 }
 0x2c0   :  { %1405 = vmatprep.subr.bf16.mxu0 %v3016_v40  ;;  %1446 = vmatprep.subr.bf16.mxu1 %v3017_v51 }
 0x2c3   :  { %1406 = vmatpush1.bf16.msra.mxu0 %v3018_v11  ;;  %1447 = vmatpush1.bf16.msra.mxu1 %v3019_v46 }
 0x2c4   :  { %1473 = vmatprep.subr.bf16.mxu0 %v3020_v47  ;;  %1514 = vmatprep.subr.bf16.mxu1 %v3021_v10 }
 0x336   :  { %v1121_v7 = vpop.f32.mrb[16].mxu0  ;;  %v1162_v9 = vpop.f32.mrb[16].mxu1 }
 0x337   :  { %v1123_v57 = vpop.f32.mrb[17].mxu0  ;;  %v1164_v58 = vpop.f32.mrb[17].mxu1 }
 0x338   :  { %v1125_v61 = vpop.f32.mrb[18].mxu0  ;;  %v1166_v13 = vpop.f32.mrb[18].mxu1 }
 0x339   :  { %v1126_v1 = vpop.f32.mrb[19].mxu0  ;;  %v1167_v38 = vpop.f32.mrb[19].mxu1 }
 0x359   :  { %v1203_v59 = vpop.f32.mrb[20].mxu0  ;;  %v1244_v63 = vpop.f32.mrb[20].mxu1 }
 0x35a   :  { %v1204_v50 = vadd.f32 %v1203_v59, %v1121_v7  ;;  %v1245_v52 = vadd.f32 %v1244_v63, %v1162_v9  ;;  %v1205_v53 = vpop.f32.mrb[21].mxu0  ;;  %v1246_v55 = vpop.f32.mrb[21].mxu1 }
 0x35b   :  { %v1206_v5 = vadd.f32 %v1205_v53, %v1123_v57  ;;  %v1247_v0 = vadd.f32 %v1246_v55, %v1164_v58  ;;  %v1207_v8 = vpop.f32.mrb[22].mxu0  ;;  %v1248_v48 = vpop.f32.mrb[22].mxu1  ;;  %v3026_v55 = vld [vmem:[#allocation18_spill] sm:$0xff] }
 0x35c   :  { %v1251_v6 = vadd.f32 %v1204_v50, %v3023_v4  ;;  %v1208_v60 = vpop.f32.mrb[23].mxu0  ;;  %v1249_v40 = vpop.f32.mrb[23].mxu1  ;;  %v1253_v49 = vadd.f32 %v1245_v52, %v2609_v12  ;;  %v3025_v52 = vld [vmem:[#allocation82_spill] sm:$0xff]  ;;  %v3027_v48 = vld [vmem:[#allocation81_spill] sm:$0xff] }
 0x35d   :  { %v1252_v51 = vadd.f32 %v1206_v5, %v2744_v2  ;;  %v1254_v47 = vadd.f32 %v1247_v0, %v3024_v54 }
 0x35e   :  { %v1716_v11 = vmul.f32 -1.442695, %v1251_v6  ;;  %v1718_v10 = vmul.f32 -1.442695, %v1253_v49 }
 0x35f   :  { %v1717_v46 = vmul.f32 -1.442695, %v1252_v51 }
 0x360   :  { %1938 = vpow2.f32 %v1716_v11 }
 0x361   :  { %1940 = vpow2.f32 %v1717_v46 }
 0x362   :  { %1942 = vtanh.f32 %v1254_v47 }
 0x363   :  { %1944 = vpow2.f32 %v1718_v10  ;;  %v3028_v10 = vld [vmem:[#allocation19_spill] sm:$0xff] }
 0x36a   :  { %v1939_v7 = vpop.eup %1938 }
 0x36b   :  { %v1264_v9 = vadd.f32 1.0, %v1939_v7  ;;  %v1941_v57 = vpop.eup %1940 }
 0x36c   :  { %v1265_v58 = vadd.f32 1.0, %v1941_v57  ;;  %v1943_v61 = vpop.eup %1942 }
 0x36d   :  { %1946 = vrcp.f32 %v1264_v9  ;;  %v1945_v13 = vpop.eup %1944  ;;  %v3029_v9 = vld [vmem:[#allocation20_spill] sm:$0xff] }
 0x36e   :  { %1948 = vrcp.f32 %v1265_v58  ;;  %v1266_v63 = vadd.f32 1.0, %v1945_v13 }
 0x370   :  { %1950 = vrcp.f32 %v1266_v63 }
 0x377   :  { %v1947_v1 = vpop.eup %1946 }
 0x378   :  { %v1275_v38 = vmul.f32 %v1947_v1, %v1943_v61  ;;  %v1949_v59 = vpop.eup %1948 }
 0x379   :  { %v1313_v62 = vpop.f32.mrb[4].mxu0  ;;  %v1354_v50 = vpop.f32.mrb[4].mxu1  ;;  %v1274_v53 = vmul.f32 %v1949_v59, %v3025_v52 }
 0x37a   :  { %v1727_v5 = vadd.f32 %v1313_v62, %v3026_v55  ;;  %v1315_v0 = vpop.f32.mrb[5].mxu0  ;;  %v1356_v8 = vpop.f32.mrb[5].mxu1  ;;  %v1729_v7 = vadd.f32 %v1354_v50, %v3028_v10 }
 0x37b   :  { %v1728_v6 = vadd.f32 %v1315_v0, %v3027_v48  ;;  %v1317_v60 = vpop.f32.mrb[6].mxu0  ;;  %v1358_v40 = vpop.f32.mrb[6].mxu1  ;;  %v2753_v51 = vadd.f32 %v1275_v38, %v1274_v53  ;;  %v1730_v57 = vadd.f32 %v1356_v8, %v3029_v9 }
 0x37c   :  { %v1719_v11 = vmul.f32 -1.442695, %v1727_v5  ;;  %v1318_v46 = vpop.f32.mrb[7].mxu0  ;;  %v1359_v49 = vpop.f32.mrb[7].mxu1  ;;  %v1721_v61 = vmul.f32 -1.442695, %v1729_v7 }
 0x37d   :  { %v1720_v47 = vmul.f32 -1.442695, %v1728_v6  ;;  %1952 = vtanh.f32 %v2753_v51  ;;  %v1951_v58 = vpop.eup %1950 }
 0x37e   :  { %1954 = vpow2.f32 %v1719_v11 }
 0x37f   :  { %1956 = vpow2.f32 %v1720_v47 }
 0x380   :  { %1958 = vtanh.f32 %v1730_v57 }
 0x381   :  { %1960 = vpow2.f32 %v1721_v61 }
 0x387   :  { %v1953_v13 = vpop.eup %1952 }
 0x388   :  { %v1955_v1 = vpop.eup %1954  ;;  %v1278_v59 = vmul.f32 %v1953_v13, %v1951_v58 }
 0x389   :  { %v1374_v38 = vadd.f32 1.0, %v1955_v1  ;;  %v1957_v62 = vpop.eup %1956 }
 0x38a   :  { %v1390_v52 = vpack.c.bf16 %v1278_v59, %v1278_v59  ;;  %v1375_v63 = vadd.f32 1.0, %v1957_v62  ;;  %v1959_v50 = vpop.eup %1958 }
 0x38b   :  { %1962 = vrcp.f32 %v1374_v38 }
 0x38c   :  { %1424 = vmatmul.mubr.bf16.vlgmr.msra.gmra.mrb[24].mxu0 %v1390_v52  ;;  %1465 = vmatmul.mubr.bf16.vlgmr.msra.gmra.mrb[24].mxu1 %v1390_v52  ;;  %1964 = vrcp.f32 %v1375_v63 }
 0x38d   :  { %1474 = vmatpush1.bf16.msra.mxu0 %v2256_v14  ;;  %1515 = vmatpush1.bf16.msra.mxu1 %v2258_v15  ;;  %v1961_v14 = vpop.eup %1960 }
 0x38e   :  { %1475 = vmatprep.subr.bf16.mxu0 %v2264_v16  ;;  %1516 = vmatprep.subr.bf16.mxu1 %v2266_v17  ;;  %v1376_v17 = vadd.f32 1.0, %v1961_v14 }
 0x38f   :  { %1505 = vmatprep.mubr.bf16.mxu0 %v2922_v56  ;;  %1546 = vmatprep.mubr.bf16.mxu1 %v2922_v56 }
 0x390   :  { %1966 = vrcp.f32 %v1376_v17 }
 0x391   :  { %1476 = vmatpush1.bf16.msra.mxu0 %v2268_v18  ;;  %1517 = vmatpush1.bf16.msra.mxu1 %v2270_v19 }
 0x392   :  { %1477 = vmatprep.subr.bf16.mxu0 %v2276_v20  ;;  %1518 = vmatprep.subr.bf16.mxu1 %v2278_v21 }
 0x395   :  { %v1963_v53 = vpop.eup %1962  ;;  %1478 = vmatpush1.bf16.msra.mxu0 %v2280_v22  ;;  %1519 = vmatpush1.bf16.msra.mxu1 %v2282_v23 }
 0x396   :  { %v1385_v15 = vmul.f32 %v1963_v53, %v1959_v50  ;;  %1479 = vmatprep.subr.bf16.mxu0 %v2288_v24  ;;  %1520 = vmatprep.subr.bf16.mxu1 %v2290_v25  ;;  %v1965_v16 = vpop.eup %1964 }
 0x397   :  { %v1384_v18 = vmul.f32 %v1965_v16, %v2658_v3 }
 0x399   :  { %1480 = vmatpush1.bf16.msra.mxu0 %v2292_v26  ;;  %1521 = vmatpush1.bf16.msra.mxu1 %v2294_v27  ;;  %v1386_v19 = vadd.f32 %v1385_v15, %v1384_v18 }
 0x39a   :  { %1481 = vmatprep.subr.bf16.mxu0 %v2300_v28  ;;  %1522 = vmatprep.subr.bf16.mxu1 %v2302_v29  ;;  %v1967_v20 = vpop.eup %1966 }
 0x39b   :  { %1968 = vtanh.f32 %v1386_v19 }
 0x39d   :  { %1482 = vmatpush1.bf16.msra.mxu0 %v2304_v30  ;;  %1523 = vmatpush1.bf16.msra.mxu1 %v2306_v31 }
 0x39e   :  { %1483 = vmatprep.subr.bf16.mxu0 %v2314_v33  ;;  %1524 = vmatprep.subr.bf16.mxu1 %v2318_v35 }
 0x3a1   :  { %1484 = vmatpush1.bf16.msra.mxu0 %v2312_v32  ;;  %1525 = vmatpush1.bf16.msra.mxu1 %v2316_v34 }
 0x3a2   :  { %1485 = vmatprep.subr.bf16.mxu0 %v2320_v36  ;;  %1526 = vmatprep.subr.bf16.mxu1 %v2323_v37 }
 0x3a5   :  { %1486 = vmatpush1.bf16.msra.mxu0 %v2327_v39  ;;  %1527 = vmatpush1.bf16.msra.mxu1 %v2331_v41  ;;  %v1969_v21 = vpop.eup %1968 }
 0x3a6   :  { %1487 = vmatprep.subr.bf16.mxu0 %v2333_v42  ;;  %1528 = vmatprep.subr.bf16.mxu1 %v2337_v43  ;;  %v1388_v22 = vmul.f32 %v1969_v21, %v1967_v20 }
 0x3a8   :  { %v1389_v23 = vpack.c.bf16 %v1388_v22, %v1388_v22 }
 0x3a9   :  { %1488 = vmatpush1.bf16.msra.mxu0 %v2342_v44  ;;  %1529 = vmatpush1.bf16.msra.mxu1 %v2347_v45 }
 0x3ac   :  { %1506 = vmatmul.mubr.bf16.vlgmr.msra.gmra.mrb[28].mxu0 %v1389_v23  ;;  %1547 = vmatmul.mubr.bf16.vlgmr.msra.gmra.mrb[28].mxu1 %v1389_v23 }
 0x45f   :  { %v1425_v24 = vpop.f32.mrb[24].mxu0  ;;  %v1466_v25 = vpop.f32.mrb[24].mxu1 }
 0x460   :  { %v1427_v26 = vpop.f32.mrb[25].mxu0  ;;  %v1468_v27 = vpop.f32.mrb[25].mxu1 }
 0x461   :  { %v1429_v28 = vpop.f32.mrb[26].mxu0  ;;  %v1470_v29 = vpop.f32.mrb[26].mxu1 }
 0x462   :  { %v1430_v30 = vpop.f32.mrb[27].mxu0  ;;  %v1471_v31 = vpop.f32.mrb[27].mxu1 }
 0x47f   :  { %v1507_v32 = vpop.f32.mrb[28].mxu0  ;;  %v1548_v33 = vpop.f32.mrb[28].mxu1 }
 0x480   :  { %v1508_v34 = vadd.f32 %v1507_v32, %v1425_v24  ;;  %v1549_v35 = vadd.f32 %v1548_v33, %v1466_v25  ;;  %v1509_v36 = vpop.f32.mrb[29].mxu0  ;;  %v1550_v37 = vpop.f32.mrb[29].mxu1 }
 0x481   :  { %v1510_v39 = vadd.f32 %v1509_v36, %v1427_v26  ;;  %v1551_v41 = vadd.f32 %v1550_v37, %v1468_v27  ;;  %v1511_v42 = vpop.f32.mrb[30].mxu0  ;;  %v1552_v43 = vpop.f32.mrb[30].mxu1 }
 0x482   :  { %v1555_v44 = vadd.f32 %v1508_v34, %v3023_v4  ;;  %v1512_v45 = vpop.f32.mrb[31].mxu0  ;;  %v1553_v56 = vpop.f32.mrb[31].mxu1  ;;  %v1557_v0 = vadd.f32 %v1549_v35, %v2609_v12 }
 0x483   :  { %v1556_v3 = vadd.f32 %v1510_v39, %v2744_v2  ;;  %v1558_v8 = vadd.f32 %v1551_v41, %v3024_v54 }
 0x484   :  { %v1722_v55 = vmul.f32 -1.442695, %v1555_v44  ;;  %v1724_v48 = vmul.f32 -1.442695, %v1557_v0 }
 0x485   :  { %v1723_v5 = vmul.f32 -1.442695, %v1556_v3 }
 0x486   :  { %1970 = vpow2.f32 %v1722_v55 }
 0x487   :  { %1972 = vpow2.f32 %v1723_v5 }
 0x488   :  { %1974 = vtanh.f32 %v1558_v8 }
 0x489   :  { %1976 = vpow2.f32 %v1724_v48 }
 0x490   :  { %v1971_v6 = vpop.eup %1970 }
 0x491   :  { %v1568_v60 = vadd.f32 1.0, %v1971_v6  ;;  %v1973_v40 = vpop.eup %1972 }
 0x492   :  { %v1569_v4 = vadd.f32 1.0, %v1973_v40  ;;  %v1975_v11 = vpop.eup %1974 }
 0x493   :  { %1978 = vrcp.f32 %v1568_v60  ;;  %v1977_v46 = vpop.eup %1976 }
 0x494   :  { %1980 = vrcp.f32 %v1569_v4  ;;  %v1570_v10 = vadd.f32 1.0, %v1977_v46 }
 0x496   :  { %1982 = vrcp.f32 %v1570_v10 }
 0x49d   :  { %v1979_v2 = vpop.eup %1978 }
 0x49e   :  { %v1579_v49 = vmul.f32 %v1979_v2, %v1975_v11  ;;  %v1981_v47 = vpop.eup %1980 }
 0x49f   :  { %v1578_v7 = vmul.f32 %v1981_v47, %v2753_v51 }
 0x4a0   :  { %v1983_v54 = vpop.eup %1982 }
 0x4a1   :  { %v1580_v12 = vadd.f32 %v1579_v49, %v1578_v7 }
 0x4a3   :  { %1984 = vtanh.f32 %v1580_v12 }
 0x4ad   :  { %v1985_v9 = vpop.eup %1984 }
 0x4ae   :  { %v1582_v57 = vmul.f32 %v1985_v9, %v1983_v54 }
 0x4b0   :  { %1583 = vst [vmem:[#allocation11] sm:$0xff] %v1582_v57 }
 0x4b1   :  { %2107 = shalt.err (!%p2104_p2)
}
 0x4b2   :  { %s2108_s20 = scalar_lea.hbm %s2815_s7, 128 }
 0x4b3   :  { %p2109_p3 = scmp.ne.s32.totalorder %s2815_s7, %s2108_s20  ;;  %p2112_p4 = scmp.lt.u32.totalorder %s2108_s20, %s2815_s7 }
 0x4b5   :  { %p2114_p5 = pnand %p2112_p4, %p2109_p3 }
 0x4b7   :  { %2117 = shalt.err (!%p2114_p5)
}
 0x4b8   :  { %1593 = dma.vmem_to_hbm [thread:$0]  %s1591_s15, 128, %s2815_s7, [#allocation4]  }
 0x4b9   :  { %2124 = dma.done.wait [#allocation4], 128  }
 0x4ba   :  { %2125 = vsyncadd [#allocation4], 4294967168 }
 0x4bb   :  { %1597 = vsyncpa [#allocation3], 1 }
 0x4bc   :  { %1598 = vsyncpa [#allocation6], 1 }
 0x4bd   :  { %1599 = vsyncpa [#allocation9], 1 }
 0x4be   :  { %1600 = vsyncpa [#allocation4], 1 }

</bundles_post_ra>
